<compile_context>
chip_gen: v5e
topology: v5e:2x2
jax: 0.10.0
libtpu: 0.0.40
codegen_flags: <defaults>
</compile_context>

<pallas_src>
import jax
import jax.numpy as jnp
from jax.experimental import pallas as pl
from jax.experimental.pallas import tpu as pltpu


def _autoencoder_kernel(x_ref, we_ref, be_ref, wd_ref, bd_ref, o_ref, h_ref):
    # One (batch-tile i, decoder-column-chunk j) grid step.
    #   x_ref:  (TB, D_in)    batch tile (input dtype, e.g. f32)
    #   we_ref: (D_in, D_hid) full encoder weight ([in, out] = PyTorch W.T)
    #   be_ref: (1, D_hid)    encoder bias (f32)
    #   wd_ref: (D_hid, DN)   decoder weight column chunk ([in, out])
    #   bd_ref: (1, DN)       decoder bias chunk (f32)
    #   o_ref:  (TB, DN)      reconstructed output chunk
    #   h_ref:  (TB, D_hid)   bf16 VMEM scratch with the encoded activations
    j = pl.program_id(1)

    @pl.when(j == 0)
    def _():
        # Encoder: once per batch tile. Casts to bf16 happen on the VPU next
        # to the matmul (no wrapper-side convert, no doubled weight traffic);
        # MXU accumulation and the bias add stay f32.
        x = x_ref[...].astype(jnp.bfloat16)
        we = we_ref[...].astype(jnp.bfloat16)
        h = jnp.dot(x, we, preferred_element_type=jnp.float32) + be_ref[...]
        h_ref[...] = h.astype(h_ref.dtype)

    # Decoder for this lane-dense column chunk; w_dec / b_dec / output stream
    # chunk-by-chunk across j so their DMA overlaps the MXU work.
    y = jnp.dot(h_ref[...], wd_ref[...].astype(jnp.bfloat16),
                preferred_element_type=jnp.float32) + bd_ref[...]
    o_ref[...] = y.astype(o_ref.dtype)


def _pick_divisor(total, candidates):
    for c in candidates:
        if total % c == 0:
            return c
    return total


def mlp_autoencoder_forward(x, w_enc, b_enc, w_dec, b_dec, *, tb=None, dn=None,
                            out_dtype=None):
    """Pallas forward of SimpleMLPAutoEncoder: (x @ w_enc + b_enc) @ w_dec + b_dec.

    w_enc: [input_dim, hidden_dim]  (PyTorch encoder.weight.T)
    w_dec: [hidden_dim, input_dim]  (PyTorch decoder.weight.T)
    """
    B, D_in = x.shape
    D_hid = w_enc.shape[1]
    out_dtype = x.dtype if out_dtype is None else out_dtype

    # Batch tile: single block up to 512 rows; 512-row tiles (multiple of 128)
    # at larger B for HBM-roofline efficiency and v7x megacore sharding.
    if tb is None:
        tb = B if B <= 512 else _pick_divisor(B, (512, 384, 256, 128))
    if B % tb != 0:
        raise ValueError(f"batch {B} must be divisible by batch tile {tb}")

    # Decoder-output column chunk: lane-dense (multiple of 128) so the output
    # stores are unmasked vst and w_dec streams in pipelined chunks.
    if dn is None:
        dn = _pick_divisor(D_in, (512, 256, 128)) if D_in % 128 == 0 else D_in
    if D_in % dn != 0:
        raise ValueError(f"input_dim {D_in} must be divisible by chunk {dn}")

    # Biases as (1, D) f32 rows for the f32 epilogue. Weights pass through in
    # their stored dtype; any bf16 cast happens in-kernel on the VPU.
    b_enc2 = b_enc.reshape(1, D_hid).astype(jnp.float32)
    b_dec2 = b_dec.reshape(1, D_in).astype(jnp.float32)

    nbytes = lambda a: a.size * jnp.dtype(a.dtype).itemsize
    cost = pl.CostEstimate(
        flops=4 * B * D_in * D_hid,           # two matmuls of 2*B*D_in*D_hid
        transcendentals=0,
        bytes_accessed=(nbytes(x) + B * D_in * jnp.dtype(out_dtype).itemsize
                        + nbytes(w_enc) + nbytes(w_dec)
                        + nbytes(b_enc2) + nbytes(b_dec2)),
    )

    return pl.pallas_call(
        _autoencoder_kernel,
        out_shape=jax.ShapeDtypeStruct((B, D_in), out_dtype),
        grid=(B // tb, D_in // dn),
        in_specs=[
            pl.BlockSpec((tb, D_in), lambda i, j: (i, 0)),      # x batch tile
            pl.BlockSpec((D_in, D_hid), lambda i, j: (0, 0)),   # encoder W (resident)
            pl.BlockSpec((1, D_hid), lambda i, j: (0, 0)),      # encoder b
            pl.BlockSpec((D_hid, dn), lambda i, j: (0, j)),     # decoder W chunk
            pl.BlockSpec((1, dn), lambda i, j: (0, j)),         # decoder b chunk
        ],
        out_specs=pl.BlockSpec((tb, dn), lambda i, j: (i, j)),  # lane-dense out
        scratch_shapes=[pltpu.VMEM((tb, D_hid), jnp.bfloat16)],
        compiler_params=pltpu.CompilerParams(
            # Batch tiles are independent (megacore-shardable on v7x at large
            # B); the column-chunk axis reuses the h scratch written at j == 0.
            dimension_semantics=("parallel", "arbitrary"),
        ),
        cost_estimate=cost,
    )(x, w_enc, b_enc2, w_dec, b_dec2)


def reference_forward_f32(x, w_enc, b_enc, w_dec, b_dec):
    h = x @ w_enc + b_enc
    return h @ w_dec + b_dec


def reference_forward_bf16(x, w_enc, b_enc, w_dec, b_dec):
    # Mirrors the kernel's mixed precision: bf16 matmul operands, f32 accum,
    # f32 bias adds, h downcast to bf16 before the decoder matmul.
    h = jnp.dot(x.astype(jnp.bfloat16), w_enc.astype(jnp.bfloat16),
                preferred_element_type=jnp.float32) + b_enc
    y = jnp.dot(h.astype(jnp.bfloat16), w_dec.astype(jnp.bfloat16),
                preferred_element_type=jnp.float32) + b_dec
    return y


if __name__ == "__main__":
    # Shapes from the module's Config: input_dim=1280, hidden_dim=256,
    # batch_size=64 (small: ~330 KB activations, ~2.6 MB weights).
    B, D_in, D_hid = 64, 1280, 256

    key = jax.random.PRNGKey(0)
    kx, kwe, kbe, kwd, kbd = jax.random.split(key, 5)

    x = jax.random.normal(kx, (B, D_in), dtype=jnp.float32)

    # PyTorch nn.Linear init: U(-1/sqrt(fan_in), 1/sqrt(fan_in)); weights are
    # stored already transposed relative to PyTorch ([in, out]).
    bound_e = 1.0 / jnp.sqrt(D_in)
    bound_d = 1.0 / jnp.sqrt(D_hid)
    w_enc = jax.random.uniform(kwe, (D_in, D_hid), jnp.float32, -bound_e, bound_e)
    b_enc = jax.random.uniform(kbe, (D_hid,), jnp.float32, -bound_e, bound_e)
    w_dec = jax.random.uniform(kwd, (D_hid, D_in), jnp.float32, -bound_d, bound_d)
    b_dec = jax.random.uniform(kbd, (D_in,), jnp.float32, -bound_d, bound_d)

    out = jax.block_until_ready(
        mlp_autoencoder_forward(x, w_enc, b_enc, w_dec, b_dec))
    assert out.shape == (B, D_in)
    assert out.dtype == x.dtype

    # Tight check against a reference with identical mixed precision.
    ref_bf16 = reference_forward_bf16(x, w_enc, b_enc, w_dec, b_dec)
    assert jnp.allclose(out, ref_bf16, atol=1e-3, rtol=1e-3), \
        "mismatch vs bf16-matched reference"

    # Semantic sanity check against the pure-f32 PyTorch-equivalent forward
    # (loose tolerance accounts for bf16 matmul operands).
    ref_f32 = reference_forward_f32(x, w_enc, b_enc, w_dec, b_dec)
    assert jnp.allclose(out, ref_f32, atol=5e-2, rtol=5e-2), \
        "mismatch vs f32 reference"

    print("KERNEL_OK")
</pallas_src>

<mosaic_0001>
module attributes {stable_mosaic.version = 11 : i64} {
  func.func @_autoencoder_kernel(%arg0: i32, %arg1: i32, %arg2: memref<64x1280xf32, #tpu.memory_space<vmem>>, %arg3: memref<1280x256xf32, #tpu.memory_space<vmem>>, %arg4: memref<1x256xf32, #tpu.memory_space<vmem>>, %arg5: memref<256x256xf32, #tpu.memory_space<vmem>>, %arg6: memref<1x256xf32, #tpu.memory_space<vmem>>, %arg7: memref<64x256xf32, #tpu.memory_space<vmem>>, %arg8: memref<64x256xbf16, #tpu.memory_space<vmem>>) attributes {dimension_semantics = [#tpu.dimension_semantics<parallel>, #tpu.dimension_semantics<arbitrary>], iteration_bounds = array<i64: 1, 5>, scalar_prefetch = 0 : i64, scratch_operands = 1 : i64, tpu.core_type = #tpu.core_type<tc>, window_params = [{transform_indices = @transform_0, window_bounds = array<i64: 64, 1280>}, {pipeline_mode = #tpu.pipeline_mode<synchronous>, transform_indices = @transform_1, window_bounds = array<i64: 1280, 256>}, {pipeline_mode = #tpu.pipeline_mode<synchronous>, transform_indices = @transform_2, window_bounds = array<i64: 1, 256>}, {transform_indices = @transform_3, window_bounds = array<i64: 256, 256>}, {transform_indices = @transform_4, window_bounds = array<i64: 1, 256>}, {transform_indices = @transform_5, window_bounds = array<i64: 64, 256>}]} {
    %c0_i32 = arith.constant 0 : i32
    %0 = arith.cmpi eq, %arg1, %c0_i32 : i32
    %1 = arith.extui %0 : i1 to i32
    %c0_i32_0 = arith.constant 0 : i32
    %2 = arith.cmpi ne, %1, %c0_i32_0 : i32
    scf.if %2 {
      %c0_8 = arith.constant 0 : index
      %c0_9 = arith.constant 0 : index
      %11 = vector.load %arg2[%c0_8, %c0_9] : memref<64x1280xf32, #tpu.memory_space<vmem>>, vector<64x1280xf32>
      %12 = arith.truncf %11 : vector<64x1280xf32> to vector<64x1280xbf16>
      %c0_10 = arith.constant 0 : index
      %c0_11 = arith.constant 0 : index
      %13 = vector.load %arg3[%c0_10, %c0_11] : memref<1280x256xf32, #tpu.memory_space<vmem>>, vector<1280x256xf32>
      %14 = arith.truncf %13 : vector<1280x256xf32> to vector<1280x256xbf16>
      %cst_12 = arith.constant dense<0.000000e+00> : vector<64x256xf32>
      %15 = tpu.matmul %12, %14, %cst_12 {dimension_numbers = #tpu.dot_dimension_numbers<[1], [0], [0], [1], [0, 0, 1, 1], [], []>} : vector<64x1280xbf16>, vector<1280x256xbf16>, vector<64x256xf32> -> vector<64x256xf32>
      %c0_13 = arith.constant 0 : index
      %c0_14 = arith.constant 0 : index
      %16 = vector.load %arg4[%c0_13, %c0_14] : memref<1x256xf32, #tpu.memory_space<vmem>>, vector<1x256xf32>
      %17 = vector.broadcast %16 : vector<1x256xf32> to vector<64x256xf32>
      %18 = arith.addf %15, %17 : vector<64x256xf32>
      %19 = arith.truncf %18 : vector<64x256xf32> to vector<64x256xbf16>
      %c0_15 = arith.constant 0 : index
      %c0_16 = arith.constant 0 : index
      %20 = vector.load %arg8[%c0_15, %c0_16] : memref<64x256xbf16, #tpu.memory_space<vmem>>, vector<64x256xbf16>
      tpu.vector_store %arg8[%c0_15, %c0_16], %19 {strides = array<i32>} : memref<64x256xbf16, #tpu.memory_space<vmem>>, vector<64x256xbf16>,
    } else {
    }
    %c0 = arith.constant 0 : index
    %c0_1 = arith.constant 0 : index
    %3 = vector.load %arg8[%c0, %c0_1] : memref<64x256xbf16, #tpu.memory_space<vmem>>, vector<64x256xbf16>
    %c0_2 = arith.constant 0 : index
    %c0_3 = arith.constant 0 : index
    %4 = vector.load %arg5[%c0_2, %c0_3] : memref<256x256xf32, #tpu.memory_space<vmem>>, vector<256x256xf32>
    %5 = arith.truncf %4 : vector<256x256xf32> to vector<256x256xbf16>
    %cst = arith.constant dense<0.000000e+00> : vector<64x256xf32>
    %6 = tpu.matmul %3, %5, %cst {dimension_numbers = #tpu.dot_dimension_numbers<[1], [0], [0], [1], [0, 0, 1, 1], [], []>} : vector<64x256xbf16>, vector<256x256xbf16>, vector<64x256xf32> -> vector<64x256xf32>
    %c0_4 = arith.constant 0 : index
    %c0_5 = arith.constant 0 : index
    %7 = vector.load %arg6[%c0_4, %c0_5] : memref<1x256xf32, #tpu.memory_space<vmem>>, vector<1x256xf32>
    %8 = vector.broadcast %7 : vector<1x256xf32> to vector<64x256xf32>
    %9 = arith.addf %6, %8 : vector<64x256xf32>
    %c0_6 = arith.constant 0 : index
    %c0_7 = arith.constant 0 : index
    %10 = vector.load %arg7[%c0_6, %c0_7] : memref<64x256xf32, #tpu.memory_space<vmem>>, vector<64x256xf32>
    tpu.vector_store %arg7[%c0_6, %c0_7], %9 {strides = array<i32>} : memref<64x256xf32, #tpu.memory_space<vmem>>, vector<64x256xf32>,
    return
  }
  func.func @transform_0(%arg0: i32, %arg1: i32) -> (i32, i32) {
    %c0_i32 = arith.constant 0 : i32
    %c0_i32_0 = arith.constant 0 : i32
    return %arg0, %c0_i32 : i32, i32
  }
  func.func @transform_1(%arg0: i32, %arg1: i32) -> (i32, i32) {
    %c0_i32 = arith.constant 0 : i32
    %c0_i32_0 = arith.constant 0 : i32
    %c0_i32_1 = arith.constant 0 : i32
    return %c0_i32, %c0_i32_0 : i32, i32
  }
  func.func @transform_2(%arg0: i32, %arg1: i32) -> (i32, i32) {
    %c0_i32 = arith.constant 0 : i32
    %c0_i32_0 = arith.constant 0 : i32
    %c0_i32_1 = arith.constant 0 : i32
    return %c0_i32, %c0_i32_0 : i32, i32
  }
  func.func @transform_3(%arg0: i32, %arg1: i32) -> (i32, i32) {
    %c0_i32 = arith.constant 0 : i32
    %c0_i32_0 = arith.constant 0 : i32
    return %c0_i32, %arg1 : i32, i32
  }
  func.func @transform_4(%arg0: i32, %arg1: i32) -> (i32, i32) {
    %c0_i32 = arith.constant 0 : i32
    %c0_i32_0 = arith.constant 0 : i32
    return %c0_i32, %arg1 : i32, i32
  }
  func.func @transform_5(%arg0: i32, %arg1: i32) -> (i32, i32) {
    %c0_i32 = arith.constant 0 : i32
    return %arg0, %arg1 : i32, i32
  }
}

</mosaic_0001>

<bundles_post_ra>
// kernel: tpu_custom_call.1
= control target key start
LH: loop header
LB: loop body
LE: loop exit
PB: predicated region body
PF: predicated region fallthrough
CT: control target
= control target key end

     0   :  { %s3069_s0 = inlined_call_operand.hbm [shape: f32[64,1280], index: 0, kind: input, shape index: {}]   ;;  %s3070_s1 = inlined_call_operand.hbm [shape: f32[1280,256], index: 1, kind: input, shape index: {}]   ;;  %s3071_s2 = inlined_call_operand.hbm [shape: f32[1,256], index: 2, kind: input, shape index: {}]   ;;  %s3072_s3 = inlined_call_operand.hbm [shape: f32[256,1280], index: 3, kind: input, shape index: {}]   ;;  %s3073_s4 = inlined_call_operand.hbm [shape: f32[1,1280], index: 4, kind: input, shape index: {}]   ;;  %s3074_s5 = inlined_call_operand.hbm [shape: f32[64,1280], index: 5, kind: output, shape index: {}]  }
   0x1   :  { %3081 = sst [smem:[#allocation22_spill]] %s3069_s0 }
   0x2   :  { %3082 = sst [smem:[#allocation23_spill]] %s3070_s1 }
   0x3   :  { %3083 = sst [smem:[#allocation24_spill]] %s3072_s3 }
   0x4   :  { %10 = vsyncpa [#allocation4], 0 }
   0x5   :  { %11 = vsyncpa [#allocation7], 0 }
   0x6   :  { %12 = vsyncpa [#allocation10], 0 }
   0x7   :  { %14 = vsyncpa [#allocation10 + $0x1], 0 }
   0x8   :  { %15 = vsyncpa [#allocation5], 0 }
   0x9   :  { %17 = vsyncpa [#allocation5 + $0x1], 0  ;;  %s2455_s18 = smov 0   ;;  %s2457_s19 = smov 0  }
   0xa   :  { %s2459_s20 = smov 0   ;;  %s2461_s21 = smov 0  }
   0xb   :  { %s2463_s22 = smov 0   ;;  %s2465_s23 = smov 0  }
   0xc LB: > { %3084 = sst [smem:[#allocation17_spill]] %s2393_s18  ;;  %s2486_s24 = sadd.s32 4294967295, %s2413_s23   ;;  %s2413_s23 = sphi %s2465_s23, %s23_s23   ;;  %s2409_s22 = sphi %s2463_s22, %s3109_s22   ;;  %s2405_s21 = sphi %s2461_s21, %s3108_s21   ;;  %s2401_s20 = sphi %s2459_s20, %s3104_s20   ;;  %s2397_s19 = sphi %s2457_s19, %s3107_s19   ;;  %s2393_s18 = sphi %s2455_s18, %s3106_s18  }
   0xd   : > { %3085 = sst [smem:[#allocation18_spill]] %s2401_s20  ;;  %s2002_s25 = sadd.s32 4294967294, %s2413_s23  }
   0xe   : > { %p123_p0 = scmp.ne.s32.totalorder %s2397_s19, %s2393_s18  ;;  %p124_p1 = scmp.eq.s32.totalorder %s2486_s24, 0 }
   0xf   : > { %p175_p2 = scmp.eq.s32.totalorder %s2486_s24, 4  ;;  %p181_p3 = scmp.eq.s32.totalorder %s2002_s25, 4 }
  0x10   : > { %p2495_p4 = por %p124_p1, %p123_p0  ;;  %p2003_p5 = scmp.ge.s32.totalorder %s2413_s23, 1 }
  0x11   : > { %p2500_p6 = por %p181_p3, %p123_p0  ;;  %p188_p7 = scmp.lt.s32.totalorder %s2413_s23, 6 }
  0x12   : > { %s3089_s1 = sld [smem:[#allocation23_spill]]  ;;  %s2415_s7 = smov [#allocation6]  }
  0x13   : > { %s3087_s27 = scalar_select %p2500_p6, 1, 0 }
  0x14   : > { %p2508_p8 = pnand %p2003_p5, %p188_p7  ;;  %s219_s8 = sshll.u32 %s2415_s7, 4  ;;  %s220_s8 = int_to_ptr.vmem [resolvable:$true] %s219_s8 }
  0x15   : > { %3088 = sst [smem:[#allocation19_spill]] %s3087_s27  ;;  %s3075_s10 = smov 256  }
  0x16   : > { %p2086_p9 = pneg %p2508_p8  ;;  %s3076_s11 = smov 16  }
  0x17   : > { %s32_s12 = sadd.s32 1, %s2409_s22  ;;  %s110_s13 = sadd.s32 1, %s2401_s20 }
  0x18   : > { %s217_s30 = sshll.u32 %s3089_s1, 4  ;;  %p2516_p10 = pnand %p2086_p9, %p124_p1  ;;  %s218_s30 = int_to_ptr.hbm [resolvable:$true] %s217_s30 }
  0x19   : > { %p33_p11 = scmp.ge.s32.totalorder %s32_s12, 5  ;;  %p117_p12 = scmp.ne.s32.totalorder %s2401_s20, %s2397_s19 }
  0x1a   : > { %2092 = dma.hbm_to_vmem [thread:$0]  (!%p2516_p10), %s218_s30, 40960, %s220_s8, [#allocation7], %s3075_s10, %s3075_s10, %s3076_s11  }
  0x1b   : > { %p118_p13 = scmp.eq.s32.totalorder %s2413_s23, 0  ;;  %s3111_s12 = smov (%p33_p11, %s32_s12), 0 }
  0x1c   : > { %3092 = sst [smem:[#allocation20_spill]] %s3111_s12  ;;  %p2538_p3 = por %p175_p2, %p117_p12 }
  0x1d   : > { %p2532_p0 = por %p118_p13, %p117_p12  ;;  %s107_s16 = ssub.s32 %s2409_s22, %s3111_s12 }
  0x1e   : > { %p108_p5 = scmp.eq.s32.totalorder %s107_s16, 0  ;;  %p2110_p7 = scmp.lt.s32.totalorder %s2413_s23, 5 }
  0x1f   : > { %s245_s17 = sand.u32 1, %s2413_s23   ;;  %s247_s25 = sand.u32 1, %s2401_s20  }
  0x20   : > { %s2548_s28 = scalar_select %p108_p5, %s2401_s20, %s110_s13  }
  0x21   : > { %s2008_s29 = sshll.u32 %s247_s25, 9  ;;  %s2058_s30 = sshll.u32 %s2409_s22, 4 }
  0x22   : > { %3095 = sst [smem:[#allocation21_spill]] %s2548_s28  ;;  %s249_s11 = scalar_lea.vmem [#allocation9], %s2008_s29 }
  0x23   : > { %s3096_s3 = sld [smem:[#allocation24_spill]]  ;;  %s257_s1 = sshll.u32 %s249_s11, 4  ;;  %s258_s1 = int_to_ptr.vmem [resolvable:$true] %s257_s1 }
  0x24   : > { %p2556_p2 = pnand %p2110_p7, %p2532_p0  ;;  %s3098_s0 = sld [smem:[#allocation22_spill]] }
  0x25   : > { %s246_s20 = scalar_lea.sflag [#allocation10], %s245_s17  ;;  %s3099_s29 = smov 16  }
  0x26   : > { %s3100_s11 = smov 256   ;;  %s2420_s12 = smov 80  }
  0x27   : > { %s2421_s17 = smov [#allocation8]  }
  0x28   : > { %s234_s13 = sshll.u32 %s2421_s17, 4  ;;  %s235_s13 = int_to_ptr.vmem [resolvable:$true] %s234_s13 }
  0x29   : > { %s254_s10 = scalar_lea.hbm %s3096_s3, %s2058_s30  ;;  %s2418_s30 = smov 1280  }
  0x2a   : > { %s255_s27 = sshll.u32 %s254_s10, 4  ;;  %s203_s28 = sshll.u32 %s3098_s0, 4  ;;  %s256_s27 = int_to_ptr.hbm [resolvable:$true] %s255_s27  ;;  %s204_s28 = int_to_ptr.hbm [resolvable:$true] %s203_s28 }
  0x2b   : > { %2099 = dma.hbm_to_vmem [thread:$0]  (!%p2556_p2), %s256_s27, 8192, %s258_s1, %s246_s20, %s2418_s30, %s3100_s11, %s3099_s29  }
  0x2c   : > { %s2419_s10 = smov [#allocation3]   ;;  %s232_s3 = sshll.u32 %s3071_s2, 4  ;;  %s233_s3 = int_to_ptr.hbm [resolvable:$true] %s232_s3 }
  0x2d   : > { %s205_s14 = sshll.u32 %s2419_s10, 4  ;;  %s2011_s0 = sshll.u32 %s247_s25, 1  ;;  %s206_s14 = int_to_ptr.vmem [resolvable:$true] %s205_s14 }
  0x2e   : > { %2089 = dma.hbm_to_vmem [thread:$0]  (!%p2516_p10), %s204_s28, 10240, %s206_s14, [#allocation4], %s2418_s30, %s2418_s30, %s2420_s12  }
  0x2f   : > { %2095 = dma.hbm_to_vmem [thread:$0]  (!%p2516_p10), %s233_s3, 32, %s235_s13, [#allocation7]  }
  0x30   : > { %s2012_s1 = sshll.u32 %s2409_s22, 1  ;;  %s271_s27 = scalar_lea.vmem [#allocation11], %s2011_s0 }
  0x31   : > { %s279_s29 = sshll.u32 %s271_s27, 4  ;;  %s275_s18 = scalar_lea.hbm %s3073_s4, %s2012_s1  ;;  %s280_s29 = int_to_ptr.vmem [resolvable:$true] %s279_s29 }
  0x32   : > { %s277_s7 = sshll.u32 %s275_s18, 4  ;;  %288 = sbr.rel (%p2508_p8) target bundleno = 794 (0x31a), region = 40  ;;  %s278_s7 = int_to_ptr.hbm [resolvable:$true] %s277_s7 }
  0x33   : > { %2102 = dma.hbm_to_vmem [thread:$0]  (!%p2556_p2), %s278_s7, 32, %s280_s29, %s246_s20  }
  0x37   : > { %2376 = dma.done.wait (%p124_p1), [#allocation4], 10240  }
  0x38   : > { %2378 = vsyncadd (%p124_p1), [#allocation4], 4294957056 }
  0x39   : > { %2380 = dma.done.wait (%p124_p1), [#allocation7], 40992  }
  0x3a   : > { %2382 = vsyncadd (%p124_p1), [#allocation7], 4294926304  ;;  %s305_s0 = sand.u32 1, %s2486_s24   ;;  %s2592_s3 = sand.u32 1, %s2397_s19  }
  0x3b   : > { %s2017_s18 = sshll.u32 %s2592_s3, 9  ;;  %s306_s20 = scalar_lea.sflag [#allocation10], %s305_s0 }
  0x3c   : > { %s2595_s6 = scalar_lea.vmem [#allocation9], %s2017_s18 }
  0x3d   : > { %2384 = dma.done.wait (%p2495_p4), %s306_s20, 8224  }
  0x3e   : > { %2386 = vsyncadd (%p2495_p4), %s306_s20, 4294959072  ;;  %s2018_s9 = sshll.u32 %s2592_s3, 1  ;;  %s2019_s25 = sshll.u32 %s2592_s3, 7 }
  0x3f   : > { %s2603_s28 = scalar_lea.vmem [#allocation11], %s2018_s9  ;;  %s2605_s16 = scalar_lea.vmem [#allocation12], %s2019_s25 }
  0x40   : > { %p2020_p1 = scmp.ne.s32.totalorder %s2405_s21, 0 }
  0x42   : > { %360 = sbr.rel (%p2020_p1) target bundleno = 562 (0x232), region = 64 }
  0x47   : > { %v509_v0 = vld [vmem:[#allocation6 + $0xe0] sm:$0xff]  ;;  %v511_v1 = vld [vmem:[#allocation6 + $0xf0] sm:$0xff] }
  0x48   : > { %v541_v2 = vld [vmem:[#allocation6 + $0x1e0] sm:$0xff]  ;;  %v815_v3 = vpack.c.bf16 %v511_v1, %v509_v0  ;;  %v543_v4 = vld [vmem:[#allocation6 + $0x1f0] sm:$0xff] }
  0x49   : > { %v573_v5 = vld [vmem:[#allocation6 + $0x2e0] sm:$0xff]  ;;  %v575_v6 = vld [vmem:[#allocation6 + $0x2f0] sm:$0xff]  ;;  %v831_v7 = vpack.c.bf16 %v543_v4, %v541_v2 }
  0x4a   : > { %v847_v8 = vpack.c.bf16 %v575_v6, %v573_v5  ;;  %v605_v9 = vld [vmem:[#allocation6 + $0x3e0] sm:$0xff]  ;;  %v607_v10 = vld [vmem:[#allocation6 + $0x3f0] sm:$0xff]  ;;  %967 = vmatpush.bf16.msra.mxu0 %v815_v3 }
  0x4b   : > { %v505_v11 = vld [vmem:[#allocation6 + $0xc0] sm:$0xff]  ;;  %v863_v12 = vpack.c.bf16 %v607_v10, %v605_v9  ;;  %v507_v13 = vld [vmem:[#allocation6 + $0xd0] sm:$0xff]  ;;  %996 = vmatpush.bf16.msra.mxu1 %v831_v7 }
  0x4c   : > { %v537_v14 = vld [vmem:[#allocation6 + $0x1c0] sm:$0xff]  ;;  %v539_v15 = vld [vmem:[#allocation6 + $0x1d0] sm:$0xff]  ;;  %1025 = vmatpush.bf16.msra.mxu2 %v847_v8  ;;  %v813_v16 = vpack.c.bf16 %v507_v13, %v505_v11 }
  0x4d   : > { %v829_v17 = vpack.c.bf16 %v539_v15, %v537_v14  ;;  %v569_v18 = vld [vmem:[#allocation6 + $0x2c0] sm:$0xff]  ;;  %v571_v19 = vld [vmem:[#allocation6 + $0x2d0] sm:$0xff]  ;;  %1054 = vmatpush.bf16.msra.mxu3 %v863_v12 }
  0x4e   : > { %v601_v20 = vld [vmem:[#allocation6 + $0x3c0] sm:$0xff]  ;;  %v845_v21 = vpack.c.bf16 %v571_v19, %v569_v18  ;;  %v603_v22 = vld [vmem:[#allocation6 + $0x3d0] sm:$0xff]  ;;  %968 = vmatpush.bf16.msra.mxu0 %v813_v16 }
  0x4f   : > { %v501_v23 = vld [vmem:[#allocation6 + $0xa0] sm:$0xff]  ;;  %v503_v24 = vld [vmem:[#allocation6 + $0xb0] sm:$0xff]  ;;  %v861_v25 = vpack.c.bf16 %v603_v22, %v601_v20  ;;  %997 = vmatpush.bf16.msra.mxu1 %v829_v17 }
  0x50   : > { %v533_v26 = vld [vmem:[#allocation6 + $0x1a0] sm:$0xff]  ;;  %v535_v27 = vld [vmem:[#allocation6 + $0x1b0] sm:$0xff]  ;;  %v811_v29 = vpack.c.bf16 %v503_v24, %v501_v23  ;;  %1026 = vmatpush.bf16.msra.mxu2 %v845_v21 }
  0x51   : > { %v565_v28 = vld [vmem:[#allocation6 + $0x2a0] sm:$0xff]  ;;  %v567_v30 = vld [vmem:[#allocation6 + $0x2b0] sm:$0xff]  ;;  %v827_v33 = vpack.c.bf16 %v535_v27, %v533_v26  ;;  %1055 = vmatpush.bf16.msra.mxu3 %v861_v25 }
  0x52   : > { %v597_v31 = vld [vmem:[#allocation6 + $0x3a0] sm:$0xff]  ;;  %v599_v32 = vld [vmem:[#allocation6 + $0x3b0] sm:$0xff]  ;;  %v843_v34 = vpack.c.bf16 %v567_v30, %v565_v28  ;;  %969 = vmatpush.bf16.msra.mxu0 %v811_v29  ;;  %v362_v30 = vld [vmem:[#allocation3 + $0x8] sm:$0xff] }
  0x53   : > { %v497_v35 = vld [vmem:[#allocation6 + $0x80] sm:$0xff]  ;;  %v499_v36 = vld [vmem:[#allocation6 + $0x90] sm:$0xff]  ;;  %v859_v38 = vpack.c.bf16 %v599_v32, %v597_v31  ;;  %998 = vmatpush.bf16.msra.mxu1 %v827_v33  ;;  %v372_v31 = vld [vmem:[#allocation3 + $0x58] sm:$0xff] }
  0x54   : > { %v529_v37 = vld [vmem:[#allocation6 + $0x180] sm:$0xff]  ;;  %v531_v39 = vld [vmem:[#allocation6 + $0x190] sm:$0xff]  ;;  %v809_v44 = vpack.c.bf16 %v499_v36, %v497_v35  ;;  %1027 = vmatpush.bf16.msra.mxu2 %v843_v34 }
  0x55   : > { %v561_v40 = vld [vmem:[#allocation6 + $0x280] sm:$0xff]  ;;  %v563_v41 = vld [vmem:[#allocation6 + $0x290] sm:$0xff]  ;;  %v825_v45 = vpack.c.bf16 %v531_v39, %v529_v37  ;;  %1056 = vmatpush.bf16.msra.mxu3 %v859_v38 }
  0x56   : > { %v593_v42 = vld [vmem:[#allocation6 + $0x380] sm:$0xff]  ;;  %v595_v43 = vld [vmem:[#allocation6 + $0x390] sm:$0xff]  ;;  %v841_v46 = vpack.c.bf16 %v563_v41, %v561_v40  ;;  %970 = vmatpush.bf16.msra.mxu0 %v809_v44  ;;  %v364_v41 = vld [vmem:[#allocation3 + $0x18] sm:$0xff] }
  0x57   : > { %v493_v47 = vld [vmem:[#allocation6 + $0x60] sm:$0xff]  ;;  %v495_v48 = vld [vmem:[#allocation6 + $0x70] sm:$0xff]  ;;  %v857_v50 = vpack.c.bf16 %v595_v43, %v593_v42  ;;  %999 = vmatpush.bf16.msra.mxu1 %v825_v45  ;;  %v374_v42 = vld [vmem:[#allocation3 + $0x68] sm:$0xff] }
  0x58   : > { %v525_v49 = vld [vmem:[#allocation6 + $0x160] sm:$0xff]  ;;  %v527_v51 = vld [vmem:[#allocation6 + $0x170] sm:$0xff]  ;;  %v807_v56 = vpack.c.bf16 %v495_v48, %v493_v47  ;;  %1028 = vmatpush.bf16.msra.mxu2 %v841_v46 }
  0x59   : > { %v557_v52 = vld [vmem:[#allocation6 + $0x260] sm:$0xff]  ;;  %v559_v53 = vld [vmem:[#allocation6 + $0x270] sm:$0xff]  ;;  %v823_v57 = vpack.c.bf16 %v527_v51, %v525_v49  ;;  %1057 = vmatpush.bf16.msra.mxu3 %v857_v50 }
  0x5a   : > { %v589_v54 = vld [vmem:[#allocation6 + $0x360] sm:$0xff]  ;;  %v591_v55 = vld [vmem:[#allocation6 + $0x370] sm:$0xff]  ;;  %v839_v58 = vpack.c.bf16 %v559_v53, %v557_v52  ;;  %971 = vmatpush.bf16.msra.mxu0 %v807_v56  ;;  %v2610_v53 = vpack.c.bf16 %v372_v31, %v362_v30 }
  0x5b   : > { %v489_v59 = vld [vmem:[#allocation6 + $0x40] sm:$0xff]  ;;  %v491_v60 = vld [vmem:[#allocation6 + $0x50] sm:$0xff]  ;;  %v855_v62 = vpack.c.bf16 %v591_v55, %v589_v54  ;;  %1000 = vmatpush.bf16.msra.mxu1 %v823_v57  ;;  %v2614_v57 = vpack.c.bf16 %v374_v42, %v364_v41 }
  0x5c   : > { %v521_v61 = vld [vmem:[#allocation6 + $0x140] sm:$0xff]  ;;  %v523_v63 = vld [vmem:[#allocation6 + $0x150] sm:$0xff]  ;;  %v805_v4 = vpack.c.bf16 %v491_v60, %v489_v59  ;;  %1029 = vmatpush.bf16.msra.mxu2 %v839_v58 }
  0x5d   : > { %v553_v0 = vld [vmem:[#allocation6 + $0x240] sm:$0xff]  ;;  %v555_v1 = vld [vmem:[#allocation6 + $0x250] sm:$0xff]  ;;  %v821_v5 = vpack.c.bf16 %v523_v63, %v521_v61  ;;  %1058 = vmatpush.bf16.msra.mxu3 %v855_v62 }
  0x5e   : > { %v585_v2 = vld [vmem:[#allocation6 + $0x340] sm:$0xff]  ;;  %v587_v3 = vld [vmem:[#allocation6 + $0x350] sm:$0xff]  ;;  %v837_v6 = vpack.c.bf16 %v555_v1, %v553_v0  ;;  %972 = vmatpush.bf16.msra.mxu0 %v805_v4 }
  0x5f   : > { %v485_v7 = vld [vmem:[#allocation6 + $0x20] sm:$0xff]  ;;  %v487_v8 = vld [vmem:[#allocation6 + $0x30] sm:$0xff]  ;;  %v853_v10 = vpack.c.bf16 %v587_v3, %v585_v2  ;;  %1001 = vmatpush.bf16.msra.mxu1 %v821_v5 }
  0x60   : > { %v517_v9 = vld [vmem:[#allocation6 + $0x120] sm:$0xff]  ;;  %v519_v11 = vld [vmem:[#allocation6 + $0x130] sm:$0xff]  ;;  %v803_v17 = vpack.c.bf16 %v487_v8, %v485_v7  ;;  %1030 = vmatpush.bf16.msra.mxu2 %v837_v6 }
  0x61   : > { %v549_v12 = vld [vmem:[#allocation6 + $0x220] sm:$0xff]  ;;  %v551_v13 = vld [vmem:[#allocation6 + $0x230] sm:$0xff]  ;;  %v819_v21 = vpack.c.bf16 %v519_v11, %v517_v9  ;;  %1059 = vmatpush.bf16.msra.mxu3 %v853_v10 }
  0x62   : > { %v581_v14 = vld [vmem:[#allocation6 + $0x320] sm:$0xff]  ;;  %v583_v15 = vld [vmem:[#allocation6 + $0x330] sm:$0xff]  ;;  %v835_v22 = vpack.c.bf16 %v551_v13, %v549_v12  ;;  %973 = vmatpush.bf16.msra.mxu0 %v803_v17 }
  0x63   : > { %v481_v16 = vld [vmem:[#allocation6] sm:$0xff]  ;;  %v483_v18 = vld [vmem:[#allocation6 + $0x10] sm:$0xff]  ;;  %v851_v26 = vpack.c.bf16 %v583_v15, %v581_v14  ;;  %1002 = vmatpush.bf16.msra.mxu1 %v819_v21 }
  0x64   : > { %v513_v19 = vld [vmem:[#allocation6 + $0x100] sm:$0xff]  ;;  %v515_v20 = vld [vmem:[#allocation6 + $0x110] sm:$0xff]  ;;  %v801_v34 = vpack.c.bf16 %v483_v18, %v481_v16  ;;  %1031 = vmatpush.bf16.msra.mxu2 %v835_v22 }
  0x65   : > { %v545_v23 = vld [vmem:[#allocation6 + $0x200] sm:$0xff]  ;;  %v547_v24 = vld [vmem:[#allocation6 + $0x210] sm:$0xff]  ;;  %v817_v38 = vpack.c.bf16 %v515_v20, %v513_v19  ;;  %1060 = vmatpush.bf16.msra.mxu3 %v851_v26  ;;  %v382_v26 = vld [vmem:[#allocation3 + $0xa8] sm:$0xff] }
  0x66   : > { %v577_v25 = vld [vmem:[#allocation6 + $0x300] sm:$0xff]  ;;  %v579_v27 = vld [vmem:[#allocation6 + $0x310] sm:$0xff]  ;;  %v833_v39 = vpack.c.bf16 %v547_v24, %v545_v23  ;;  %974 = vmatpush.bf16.msra.mxu0 %v801_v34 }
  0x67   : > { %v361_v28 = vld [vmem:[#allocation3] sm:$0xff]  ;;  %v371_v29 = vld [vmem:[#allocation3 + $0x50] sm:$0xff]  ;;  %v849_v43 = vpack.c.bf16 %v579_v27, %v577_v25  ;;  %1003 = vmatpush.bf16.msra.mxu1 %v817_v38  ;;  %v392_v27 = vld [vmem:[#allocation3 + $0xf8] sm:$0xff] }
  0x68   : > { %v701_v32 = vld [vmem:[#allocation6 + $0x6e0] sm:$0xff]  ;;  %v703_v33 = vld [vmem:[#allocation6 + $0x6f0] sm:$0xff]  ;;  %v2608_v48 = vpack.c.bf16 %v371_v29, %v361_v28  ;;  %1032 = vmatpush.bf16.msra.mxu2 %v833_v39 }
  0x69   : > { %v363_v35 = vld [vmem:[#allocation3 + $0x10] sm:$0xff]  ;;  %v733_v36 = vld [vmem:[#allocation6 + $0x7e0] sm:$0xff]  ;;  %v911_v44 = vpack.c.bf16 %v703_v33, %v701_v32  ;;  %1061 = vmatpush.bf16.msra.mxu3 %v849_v43 }
  0x6a   : > { %v735_v37 = vld [vmem:[#allocation6 + $0x7f0] sm:$0xff]  ;;  %v373_v40 = vld [vmem:[#allocation3 + $0x60] sm:$0xff]  ;;  %975 = vmatmul.bf16.vlgmr.msra.gmra.mxu0 %v2608_v48  ;;  %1004 = vmatmul.bf16.vlgmr.msra.gmra.mxu1 %v2610_v53 }
  0x6b   : > { %v637_v45 = vld [vmem:[#allocation6 + $0x4e0] sm:$0xff]  ;;  %v639_v46 = vld [vmem:[#allocation6 + $0x4f0] sm:$0xff]  ;;  %v927_v49 = vpack.c.bf16 %v735_v37, %v733_v36  ;;  %v2612_v54 = vpack.c.bf16 %v373_v40, %v363_v35  ;;  %v384_v36 = vld [vmem:[#allocation3 + $0xb8] sm:$0xff] }
  0x6c   : > { %v669_v47 = vld [vmem:[#allocation6 + $0x5e0] sm:$0xff]  ;;  %v671_v50 = vld [vmem:[#allocation6 + $0x5f0] sm:$0xff]  ;;  %v879_v58 = vpack.c.bf16 %v639_v46, %v637_v45  ;;  %1141 = vmatpush.bf16.msrb.mxu2 %v911_v44  ;;  %1062 = vmatmul.bf16.vlgmr.msra.gmra.mxu3 %v2614_v57  ;;  %v394_v37 = vld [vmem:[#allocation3 + $0x108] sm:$0xff] }
  0x6d   : > { %v697_v51 = vld [vmem:[#allocation6 + $0x6c0] sm:$0xff]  ;;  %v699_v52 = vld [vmem:[#allocation6 + $0x6d0] sm:$0xff]  ;;  %v895_v59 = vpack.c.bf16 %v671_v50, %v669_v47  ;;  %1170 = vmatpush.bf16.msrb.mxu3 %v927_v49  ;;  %1033 = vmatmul.bf16.vlgmr.msra.gmra.mxu2 %v2612_v54  ;;  %v2622_v50 = vpack.c.bf16 %v392_v27, %v382_v26 }
  0x6e   : > { %v729_v55 = vld [vmem:[#allocation6 + $0x7c0] sm:$0xff]  ;;  %v731_v56 = vld [vmem:[#allocation6 + $0x7d0] sm:$0xff]  ;;  %v909_v60 = vpack.c.bf16 %v699_v52, %v697_v51  ;;  %1083 = vmatpush.bf16.msrb.mxu0 %v879_v58 }
  0x6f   : > { %v633_v61 = vld [vmem:[#allocation6 + $0x4c0] sm:$0xff]  ;;  %v635_v62 = vld [vmem:[#allocation6 + $0x4d0] sm:$0xff]  ;;  %v925_v0 = vpack.c.bf16 %v731_v56, %v729_v55  ;;  %1112 = vmatpush.bf16.msrb.mxu1 %v895_v59  ;;  %v2626_v56 = vpack.c.bf16 %v394_v37, %v384_v36 }
  0x70   : > { %v665_v63 = vld [vmem:[#allocation6 + $0x5c0] sm:$0xff]  ;;  %v667_v1 = vld [vmem:[#allocation6 + $0x5d0] sm:$0xff]  ;;  %v877_v6 = vpack.c.bf16 %v635_v62, %v633_v61  ;;  %1142 = vmatpush.bf16.msrb.mxu2 %v909_v60 }
  0x71   : > { %v693_v2 = vld [vmem:[#allocation6 + $0x6a0] sm:$0xff]  ;;  %v695_v3 = vld [vmem:[#allocation6 + $0x6b0] sm:$0xff]  ;;  %v893_v7 = vpack.c.bf16 %v667_v1, %v665_v63  ;;  %1171 = vmatpush.bf16.msrb.mxu3 %v925_v0 }
  0x72   : > { %v725_v4 = vld [vmem:[#allocation6 + $0x7a0] sm:$0xff]  ;;  %v727_v5 = vld [vmem:[#allocation6 + $0x7b0] sm:$0xff]  ;;  %v907_v8 = vpack.c.bf16 %v695_v3, %v693_v2  ;;  %1084 = vmatpush.bf16.msrb.mxu0 %v877_v6 }
  0x73   : > { %v629_v9 = vld [vmem:[#allocation6 + $0x4a0] sm:$0xff]  ;;  %v631_v10 = vld [vmem:[#allocation6 + $0x4b0] sm:$0xff]  ;;  %v923_v12 = vpack.c.bf16 %v727_v5, %v725_v4  ;;  %1113 = vmatpush.bf16.msrb.mxu1 %v893_v7 }
  0x74   : > { %v661_v11 = vld [vmem:[#allocation6 + $0x5a0] sm:$0xff]  ;;  %v663_v13 = vld [vmem:[#allocation6 + $0x5b0] sm:$0xff]  ;;  %v875_v18 = vpack.c.bf16 %v631_v10, %v629_v9  ;;  %1143 = vmatpush.bf16.msrb.mxu2 %v907_v8 }
  0x75   : > { %v689_v14 = vld [vmem:[#allocation6 + $0x680] sm:$0xff]  ;;  %v691_v15 = vld [vmem:[#allocation6 + $0x690] sm:$0xff]  ;;  %v891_v21 = vpack.c.bf16 %v663_v13, %v661_v11  ;;  %1172 = vmatpush.bf16.msrb.mxu3 %v923_v12 }
  0x76   : > { %v721_v16 = vld [vmem:[#allocation6 + $0x780] sm:$0xff]  ;;  %v723_v17 = vld [vmem:[#allocation6 + $0x790] sm:$0xff]  ;;  %v905_v22 = vpack.c.bf16 %v691_v15, %v689_v14  ;;  %1085 = vmatpush.bf16.msrb.mxu0 %v875_v18 }
  0x77   : > { %v381_v19 = vld [vmem:[#allocation3 + $0xa0] sm:$0xff]  ;;  %v391_v20 = vld [vmem:[#allocation3 + $0xf0] sm:$0xff]  ;;  %v921_v28 = vpack.c.bf16 %v723_v17, %v721_v16  ;;  %1114 = vmatpush.bf16.msrb.mxu1 %v891_v21 }
  0x78   : > { %v625_v23 = vld [vmem:[#allocation6 + $0x480] sm:$0xff]  ;;  %v627_v24 = vld [vmem:[#allocation6 + $0x490] sm:$0xff]  ;;  %1144 = vmatpush.bf16.msrb.mxu2 %v905_v22  ;;  %v2620_v44 = vpack.c.bf16 %v391_v20, %v381_v19 }
  0x79   : > { %v657_v25 = vld [vmem:[#allocation6 + $0x580] sm:$0xff]  ;;  %v659_v29 = vld [vmem:[#allocation6 + $0x590] sm:$0xff]  ;;  %v873_v38 = vpack.c.bf16 %v627_v24, %v625_v23  ;;  %1173 = vmatpush.bf16.msrb.mxu3 %v921_v28  ;;  %v402_v28 = vld [vmem:[#allocation3 + $0x148] sm:$0xff] }
  0x7a   : > { %v685_v30 = vld [vmem:[#allocation6 + $0x660] sm:$0xff]  ;;  %v687_v31 = vld [vmem:[#allocation6 + $0x670] sm:$0xff]  ;;  %v889_v39 = vpack.c.bf16 %v659_v29, %v657_v25  ;;  %980 = vmatmul.bf16.gmra.mxu0 %v2620_v44  ;;  %1009 = vmatmul.bf16.gmra.mxu1 %v2622_v50  ;;  %v412_v29 = vld [vmem:[#allocation3 + $0x198] sm:$0xff] }
  0x7b   : > { %v383_v32 = vld [vmem:[#allocation3 + $0xb0] sm:$0xff]  ;;  %v717_v33 = vld [vmem:[#allocation6 + $0x760] sm:$0xff]  ;;  %v903_v40 = vpack.c.bf16 %v687_v31, %v685_v30  ;;  %1086 = vmatpush.bf16.msrb.mxu0 %v873_v38  ;;  %v2634_v37 = vpack.c.bf16 %v412_v29, %v402_v28 }
  0x7c   : > { %v719_v34 = vld [vmem:[#allocation6 + $0x770] sm:$0xff]  ;;  %v393_v35 = vld [vmem:[#allocation3 + $0x100] sm:$0xff]  ;;  %1115 = vmatpush.bf16.msrb.mxu1 %v889_v39  ;;  %1067 = vmatmul.bf16.gmra.mxu3 %v2626_v56 }
  0x7d   : > { %v621_v41 = vld [vmem:[#allocation6 + $0x460] sm:$0xff]  ;;  %v623_v42 = vld [vmem:[#allocation6 + $0x470] sm:$0xff]  ;;  %v919_v45 = vpack.c.bf16 %v719_v34, %v717_v33  ;;  %v2624_v51 = vpack.c.bf16 %v393_v35, %v383_v32  ;;  %1145 = vmatpush.bf16.msrb.mxu2 %v903_v40  ;;  %v404_v33 = vld [vmem:[#allocation3 + $0x158] sm:$0xff] }
  0x7e   : > { %v653_v43 = vld [vmem:[#allocation6 + $0x560] sm:$0xff]  ;;  %v655_v46 = vld [vmem:[#allocation6 + $0x570] sm:$0xff]  ;;  %v871_v58 = vpack.c.bf16 %v623_v42, %v621_v41  ;;  %v414_v34 = vld [vmem:[#allocation3 + $0x1a8] sm:$0xff] }
  0x7f   : > { %v681_v47 = vld [vmem:[#allocation6 + $0x640] sm:$0xff]  ;;  %v683_v49 = vld [vmem:[#allocation6 + $0x650] sm:$0xff]  ;;  %v887_v59 = vpack.c.bf16 %v655_v46, %v653_v43  ;;  %1174 = vmatpush.bf16.msrb.mxu3 %v919_v45  ;;  %1038 = vmatmul.bf16.gmra.mxu2 %v2624_v51  ;;  %v2638_v39 = vpack.c.bf16 %v414_v34, %v404_v33  ;;  %v510_v40 = vld [vmem:[#allocation6 + $0xe8] sm:$0xff] }
  0x80   : > { %v713_v52 = vld [vmem:[#allocation6 + $0x740] sm:$0xff]  ;;  %v715_v55 = vld [vmem:[#allocation6 + $0x750] sm:$0xff]  ;;  %v901_v60 = vpack.c.bf16 %v683_v49, %v681_v47  ;;  %1087 = vmatpush.bf16.msrb.mxu0 %v871_v58  ;;  %v512_v41 = vld [vmem:[#allocation6 + $0xf8] sm:$0xff] }
  0x81   : > { %v617_v61 = vld [vmem:[#allocation6 + $0x440] sm:$0xff]  ;;  %v619_v62 = vld [vmem:[#allocation6 + $0x450] sm:$0xff]  ;;  %v917_v63 = vpack.c.bf16 %v715_v55, %v713_v52  ;;  %1116 = vmatpush.bf16.msrb.mxu1 %v887_v59  ;;  %v816_v43 = vpack.c.bf16 %v512_v41, %v510_v40  ;;  %v542_v46 = vld [vmem:[#allocation6 + $0x1e8] sm:$0xff] }
  0x82   : > { %v649_v0 = vld [vmem:[#allocation6 + $0x540] sm:$0xff]  ;;  %v651_v1 = vld [vmem:[#allocation6 + $0x550] sm:$0xff]  ;;  %v869_v2 = vpack.c.bf16 %v619_v62, %v617_v61  ;;  %1146 = vmatpush.bf16.msrb.mxu2 %v901_v60  ;;  %v544_v47 = vld [vmem:[#allocation6 + $0x1f8] sm:$0xff] }
  0x83   : > { %v677_v3 = vld [vmem:[#allocation6 + $0x620] sm:$0xff]  ;;  %v679_v4 = vld [vmem:[#allocation6 + $0x630] sm:$0xff]  ;;  %v885_v6 = vpack.c.bf16 %v651_v1, %v649_v0  ;;  %1175 = vmatpush.bf16.msrb.mxu3 %v917_v63  ;;  %v832_v52 = vpack.c.bf16 %v544_v47, %v542_v46  ;;  %v506_v59 = vld [vmem:[#allocation6 + $0xc8] sm:$0xff] }
  0x84   : > { %v613_v5 = vld [vmem:[#allocation6 + $0x420] sm:$0xff]  ;;  %v899_v7 = vpack.c.bf16 %v679_v4, %v677_v3  ;;  %v615_v8 = vld [vmem:[#allocation6 + $0x430] sm:$0xff]  ;;  %1088 = vmatpush.bf16.msrb.mxu0 %v869_v2  ;;  %v508_v61 = vld [vmem:[#allocation6 + $0xd8] sm:$0xff] }
  0x85   : > { %v709_v9 = vld [vmem:[#allocation6 + $0x720] sm:$0xff]  ;;  %v711_v10 = vld [vmem:[#allocation6 + $0x730] sm:$0xff]  ;;  %v867_v16 = vpack.c.bf16 %v615_v8, %v613_v5  ;;  %1117 = vmatpush.bf16.msrb.mxu1 %v885_v6  ;;  %v814_v0 = vpack.c.bf16 %v508_v61, %v506_v59  ;;  %v538_v2 = vld [vmem:[#allocation6 + $0x1c8] sm:$0xff] }
  0x86   : > { %v915_v11 = vpack.c.bf16 %v711_v10, %v709_v9  ;;  %v645_v12 = vld [vmem:[#allocation6 + $0x520] sm:$0xff]  ;;  %v647_v13 = vld [vmem:[#allocation6 + $0x530] sm:$0xff]  ;;  %1147 = vmatpush.bf16.msrb.mxu2 %v899_v7  ;;  %v540_v3 = vld [vmem:[#allocation6 + $0x1d8] sm:$0xff] }
  0x87   : > { %v673_v14 = vld [vmem:[#allocation6 + $0x600] sm:$0xff]  ;;  %v675_v15 = vld [vmem:[#allocation6 + $0x610] sm:$0xff]  ;;  %v883_v19 = vpack.c.bf16 %v647_v13, %v645_v12  ;;  %v830_v5 = vpack.c.bf16 %v540_v3, %v538_v2  ;;  %v422_v10 = vld [vmem:[#allocation3 + $0x1e8] sm:$0xff] }
  0x88   : > { %v705_v17 = vld [vmem:[#allocation6 + $0x700] sm:$0xff]  ;;  %v707_v18 = vld [vmem:[#allocation6 + $0x710] sm:$0xff]  ;;  %v897_v20 = vpack.c.bf16 %v675_v15, %v673_v14  ;;  %1176 = vmatpush.bf16.msrb.mxu3 %v915_v11  ;;  %1089 = vmatpush.bf16.msrb.mxu0 %v867_v16  ;;  %v432_v11 = vld [vmem:[#allocation3 + $0x238] sm:$0xff] }
  0x89   : > { %v609_v21 = vld [vmem:[#allocation6 + $0x400] sm:$0xff]  ;;  %v611_v22 = vld [vmem:[#allocation6 + $0x410] sm:$0xff]  ;;  %v913_v23 = vpack.c.bf16 %v707_v18, %v705_v17  ;;  %1118 = vmatpush.bf16.msrb.mxu1 %v883_v19  ;;  %v424_v14 = vld [vmem:[#allocation3 + $0x1f8] sm:$0xff]  ;;  %v2646_v17 = vpack.c.bf16 %v432_v11, %v422_v10 }
  0x8a   : > { %v641_v24 = vld [vmem:[#allocation6 + $0x500] sm:$0xff]  ;;  %v643_v25 = vld [vmem:[#allocation6 + $0x510] sm:$0xff]  ;;  %v865_v32 = vpack.c.bf16 %v611_v22, %v609_v21  ;;  %1148 = vmatpush.bf16.msrb.mxu2 %v897_v20  ;;  %1014 = vmatmul.bf16.gmra.mxu1 %v2634_v37  ;;  %v434_v15 = vld [vmem:[#allocation3 + $0x248] sm:$0xff] }
  0x8b   : > { %v401_v26 = vld [vmem:[#allocation3 + $0x140] sm:$0xff]  ;;  %v411_v27 = vld [vmem:[#allocation3 + $0x190] sm:$0xff]  ;;  %v881_v35 = vpack.c.bf16 %v643_v25, %v641_v24  ;;  %v2650_v19 = vpack.c.bf16 %v434_v15, %v424_v14  ;;  %v502_v20 = vld [vmem:[#allocation6 + $0xa8] sm:$0xff] }
  0x8c   : > { %v403_v30 = vld [vmem:[#allocation3 + $0x150] sm:$0xff]  ;;  %v413_v31 = vld [vmem:[#allocation3 + $0x1a0] sm:$0xff]  ;;  %v2632_v36 = vpack.c.bf16 %v411_v27, %v401_v26  ;;  %1177 = vmatpush.bf16.msrb.mxu3 %v913_v23  ;;  %1090 = vmatpush.bf16.msrb.mxu0 %v865_v32  ;;  %v504_v21 = vld [vmem:[#allocation6 + $0xb8] sm:$0xff] }
  0x8d   : > { %v2636_v38 = vpack.c.bf16 %v413_v31, %v403_v30  ;;  %1119 = vmatpush.bf16.msrb.mxu1 %v881_v35  ;;  %1072 = vmatmul.bf16.gmra.mxu3 %v2638_v39  ;;  %v765_v42 = vld [vmem:[#allocation6 + $0x8e0] sm:$0xff]  ;;  %v767_v45 = vld [vmem:[#allocation6 + $0x8f0] sm:$0xff]  ;;  %v812_v23 = vpack.c.bf16 %v504_v21, %v502_v20  ;;  %v534_v25 = vld [vmem:[#allocation6 + $0x1a8] sm:$0xff] }
  0x8e   : > { %985 = vmatmul.bf16.gmra.mxu0 %v2632_v36  ;;  %v943_v49 = vpack.c.bf16 %v767_v45, %v765_v42  ;;  %v797_v55 = vld [vmem:[#allocation6 + $0x9e0] sm:$0xff]  ;;  %v799_v58 = vld [vmem:[#allocation6 + $0x9f0] sm:$0xff]  ;;  %1257 = vmatpush.bf16.msra.mxu2 %v816_v43  ;;  %v536_v26 = vld [vmem:[#allocation6 + $0x1b8] sm:$0xff] }
  0x8f   : > { %1043 = vmatmul.bf16.gmra.mxu2 %v2636_v38  ;;  %v959_v60 = vpack.c.bf16 %v799_v58, %v797_v55  ;;  %v761_v62 = vld [vmem:[#allocation6 + $0x8c0] sm:$0xff]  ;;  %v763_v63 = vld [vmem:[#allocation6 + $0x8d0] sm:$0xff]  ;;  %v828_v28 = vpack.c.bf16 %v536_v26, %v534_v25  ;;  %v498_v31 = vld [vmem:[#allocation6 + $0x88] sm:$0xff] }
  0x90   : > { %1199 = vmatpush.bf16.msra.mxu0 %v943_v49  ;;  %1286 = vmatpush.bf16.msra.mxu3 %v832_v52  ;;  %v941_v1 = vpack.c.bf16 %v763_v63, %v761_v62  ;;  %v793_v4 = vld [vmem:[#allocation6 + $0x9c0] sm:$0xff]  ;;  %v795_v6 = vld [vmem:[#allocation6 + $0x9d0] sm:$0xff]  ;;  %v500_v33 = vld [vmem:[#allocation6 + $0x98] sm:$0xff] }
  0x91   : > { %1228 = vmatpush.bf16.msra.mxu1 %v959_v60  ;;  %v957_v7 = vpack.c.bf16 %v795_v6, %v793_v4  ;;  %v421_v8 = vld [vmem:[#allocation3 + $0x1e0] sm:$0xff]  ;;  %v431_v9 = vld [vmem:[#allocation3 + $0x230] sm:$0xff]  ;;  %v810_v40 = vpack.c.bf16 %v500_v33, %v498_v31  ;;  %v530_v42 = vld [vmem:[#allocation6 + $0x188] sm:$0xff] }
  0x92   : > { %1258 = vmatpush.bf16.msra.mxu2 %v814_v0  ;;  %v423_v12 = vld [vmem:[#allocation3 + $0x1f0] sm:$0xff]  ;;  %v433_v13 = vld [vmem:[#allocation3 + $0x240] sm:$0xff]  ;;  %v2644_v16 = vpack.c.bf16 %v431_v9, %v421_v8  ;;  %v532_v43 = vld [vmem:[#allocation6 + $0x198] sm:$0xff] }
  0x93   : > { %v2648_v18 = vpack.c.bf16 %v433_v13, %v423_v12  ;;  %v757_v22 = vld [vmem:[#allocation6 + $0x8a0] sm:$0xff]  ;;  %v759_v24 = vld [vmem:[#allocation6 + $0x8b0] sm:$0xff]  ;;  %v826_v46 = vpack.c.bf16 %v532_v43, %v530_v42  ;;  %v366_v58 = vld [vmem:[#allocation3 + $0x28] sm:$0xff] }
  0x94   : > { %1200 = vmatpush.bf16.msra.mxu0 %v941_v1  ;;  %1287 = vmatpush.bf16.msra.mxu3 %v830_v5  ;;  %v939_v27 = vpack.c.bf16 %v759_v24, %v757_v22  ;;  %v789_v29 = vld [vmem:[#allocation6 + $0x9a0] sm:$0xff]  ;;  %v791_v30 = vld [vmem:[#allocation6 + $0x9b0] sm:$0xff]  ;;  %v376_v59 = vld [vmem:[#allocation3 + $0x78] sm:$0xff] }
  0x95   : > { %1229 = vmatpush.bf16.msra.mxu1 %v957_v7  ;;  %v955_v32 = vpack.c.bf16 %v791_v30, %v789_v29  ;;  %v753_v34 = vld [vmem:[#allocation6 + $0x880] sm:$0xff]  ;;  %v755_v35 = vld [vmem:[#allocation6 + $0x890] sm:$0xff]  ;;  %v368_v62 = vld [vmem:[#allocation3 + $0x38] sm:$0xff]  ;;  %v2658_v1 = vpack.c.bf16 %v376_v59, %v366_v58 }
  0x96   : > { %1259 = vmatpush.bf16.msra.mxu2 %v812_v23  ;;  %v937_v41 = vpack.c.bf16 %v755_v35, %v753_v34  ;;  %v785_v45 = vld [vmem:[#allocation6 + $0x980] sm:$0xff]  ;;  %v787_v47 = vld [vmem:[#allocation6 + $0x990] sm:$0xff]  ;;  %v378_v63 = vld [vmem:[#allocation3 + $0x88] sm:$0xff] }
  0x97   : > { %v953_v49 = vpack.c.bf16 %v787_v47, %v785_v45  ;;  %v365_v52 = vld [vmem:[#allocation3 + $0x20] sm:$0xff]  ;;  %v375_v55 = vld [vmem:[#allocation3 + $0x70] sm:$0xff]  ;;  %v2662_v3 = vpack.c.bf16 %v378_v63, %v368_v62  ;;  %v494_v4 = vld [vmem:[#allocation6 + $0x68] sm:$0xff] }
  0x98   : > { %1201 = vmatpush.bf16.msra.mxu0 %v939_v27  ;;  %1288 = vmatpush.bf16.msra.mxu3 %v828_v28  ;;  %v367_v60 = vld [vmem:[#allocation3 + $0x30] sm:$0xff]  ;;  %v377_v61 = vld [vmem:[#allocation3 + $0x80] sm:$0xff]  ;;  %v2656_v0 = vpack.c.bf16 %v375_v55, %v365_v52  ;;  %v496_v5 = vld [vmem:[#allocation6 + $0x78] sm:$0xff] }
  0x99   : > { %1230 = vmatpush.bf16.msra.mxu1 %v955_v32  ;;  %v2660_v2 = vpack.c.bf16 %v377_v61, %v367_v60  ;;  %v749_v6 = vld [vmem:[#allocation6 + $0x860] sm:$0xff]  ;;  %v808_v7 = vpack.c.bf16 %v496_v5, %v494_v4  ;;  %v751_v8 = vld [vmem:[#allocation6 + $0x870] sm:$0xff]  ;;  %v526_v9 = vld [vmem:[#allocation6 + $0x168] sm:$0xff] }
  0x9a   : > { %1019 = vmatmul.bf16.gmra.mxu1 %v2646_v17  ;;  %1260 = vmatpush.bf16.msra.mxu2 %v810_v40  ;;  %v528_v10 = vld [vmem:[#allocation6 + $0x178] sm:$0xff]  ;;  %v935_v11 = vpack.c.bf16 %v751_v8, %v749_v6  ;;  %v781_v13 = vld [vmem:[#allocation6 + $0x960] sm:$0xff]  ;;  %v783_v14 = vld [vmem:[#allocation6 + $0x970] sm:$0xff] }
  0x9b   : > { %v824_v12 = vpack.c.bf16 %v528_v10, %v526_v9  ;;  %v490_v15 = vld [vmem:[#allocation6 + $0x48] sm:$0xff]  ;;  %v951_v20 = vpack.c.bf16 %v783_v14, %v781_v13  ;;  %v492_v21 = vld [vmem:[#allocation6 + $0x58] sm:$0xff]  ;;  %v745_v22 = vld [vmem:[#allocation6 + $0x840] sm:$0xff] }
  0x9c   : > { %1202 = vmatpush.bf16.msra.mxu0 %v937_v41  ;;  %1289 = vmatpush.bf16.msra.mxu3 %v826_v46  ;;  %v747_v23 = vld [vmem:[#allocation6 + $0x850] sm:$0xff]  ;;  %v806_v24 = vpack.c.bf16 %v492_v21, %v490_v15  ;;  %v522_v26 = vld [vmem:[#allocation6 + $0x148] sm:$0xff]  ;;  %v524_v27 = vld [vmem:[#allocation6 + $0x158] sm:$0xff] }
  0x9d   : > { %1077 = vmatmul.bf16.gmra.mxu3 %v2650_v19  ;;  %1231 = vmatpush.bf16.msra.mxu1 %v953_v49  ;;  %v933_v25 = vpack.c.bf16 %v747_v23, %v745_v22  ;;  %v777_v28 = vld [vmem:[#allocation6 + $0x940] sm:$0xff]  ;;  %v822_v29 = vpack.c.bf16 %v524_v27, %v522_v26  ;;  %v779_v30 = vld [vmem:[#allocation6 + $0x950] sm:$0xff]  ;;  %v386_v34 = vld [vmem:[#allocation3 + $0xc8] sm:$0xff] }
  0x9e   : > { %990 = vmatmul.bf16.gmra.mxu0 %v2644_v16  ;;  %1261 = vmatpush.bf16.msra.mxu2 %v808_v7  ;;  %v949_v31 = vpack.c.bf16 %v779_v30, %v777_v28  ;;  %v385_v32 = vld [vmem:[#allocation3 + $0xc0] sm:$0xff]  ;;  %v395_v33 = vld [vmem:[#allocation3 + $0x110] sm:$0xff]  ;;  %v396_v35 = vld [vmem:[#allocation3 + $0x118] sm:$0xff] }
  0x9f   : > { %1048 = vmatmul.bf16.gmra.mxu2 %v2648_v18  ;;  %v387_v40 = vld [vmem:[#allocation3 + $0xd0] sm:$0xff]  ;;  %v397_v41 = vld [vmem:[#allocation3 + $0x120] sm:$0xff]  ;;  %v388_v42 = vld [vmem:[#allocation3 + $0xd8] sm:$0xff]  ;;  %v2668_v45 = vpack.c.bf16 %v395_v33, %v385_v32  ;;  %v2670_v46 = vpack.c.bf16 %v396_v35, %v386_v34 }
  0xa0   : > { %1203 = vmatpush.bf16.msra.mxu0 %v935_v11  ;;  %1290 = vmatpush.bf16.msra.mxu3 %v824_v12  ;;  %v398_v43 = vld [vmem:[#allocation3 + $0x128] sm:$0xff]  ;;  %v2672_v47 = vpack.c.bf16 %v397_v41, %v387_v40  ;;  %v488_v55 = vld [vmem:[#allocation6 + $0x38] sm:$0xff]  ;;  %v741_v58 = vld [vmem:[#allocation6 + $0x820] sm:$0xff] }
  0xa1   : > { %1232 = vmatpush.bf16.msra.mxu1 %v951_v20  ;;  %v2674_v49 = vpack.c.bf16 %v398_v43, %v388_v42  ;;  %v486_v52 = vld [vmem:[#allocation6 + $0x28] sm:$0xff]  ;;  %v743_v60 = vld [vmem:[#allocation6 + $0x830] sm:$0xff]  ;;  %v520_v62 = vld [vmem:[#allocation6 + $0x138] sm:$0xff] }
  0xa2   : > { %1262 = vmatpush.bf16.msra.mxu2 %v806_v24  ;;  %v804_v59 = vpack.c.bf16 %v488_v55, %v486_v52  ;;  %v518_v61 = vld [vmem:[#allocation6 + $0x128] sm:$0xff]  ;;  %v931_v63 = vpack.c.bf16 %v743_v60, %v741_v58  ;;  %v773_v5 = vld [vmem:[#allocation6 + $0x920] sm:$0xff]  ;;  %v775_v6 = vld [vmem:[#allocation6 + $0x930] sm:$0xff] }
  0xa3   : > { %v820_v4 = vpack.c.bf16 %v520_v62, %v518_v61  ;;  %v482_v7 = vld [vmem:[#allocation6 + $0x8] sm:$0xff]  ;;  %v947_v8 = vpack.c.bf16 %v775_v6, %v773_v5  ;;  %v484_v9 = vld [vmem:[#allocation6 + $0x18] sm:$0xff]  ;;  %v737_v10 = vld [vmem:[#allocation6 + $0x800] sm:$0xff] }
  0xa4   : > { %1204 = vmatpush.bf16.msra.mxu0 %v933_v25  ;;  %1291 = vmatpush.bf16.msra.mxu3 %v822_v29  ;;  %v739_v11 = vld [vmem:[#allocation6 + $0x810] sm:$0xff]  ;;  %v802_v12 = vpack.c.bf16 %v484_v9, %v482_v7  ;;  %v514_v14 = vld [vmem:[#allocation6 + $0x108] sm:$0xff]  ;;  %v516_v15 = vld [vmem:[#allocation6 + $0x118] sm:$0xff] }
  0xa5   : > { %1233 = vmatpush.bf16.msra.mxu1 %v949_v31  ;;  %v929_v13 = vpack.c.bf16 %v739_v11, %v737_v10  ;;  %v769_v20 = vld [vmem:[#allocation6 + $0x900] sm:$0xff]  ;;  %v818_v21 = vpack.c.bf16 %v516_v15, %v514_v14  ;;  %v771_v22 = vld [vmem:[#allocation6 + $0x910] sm:$0xff]  ;;  %v406_v26 = vld [vmem:[#allocation3 + $0x168] sm:$0xff] }
  0xa6   : > { %1263 = vmatpush.bf16.msra.mxu2 %v804_v59  ;;  %v945_v23 = vpack.c.bf16 %v771_v22, %v769_v20  ;;  %v405_v24 = vld [vmem:[#allocation3 + $0x160] sm:$0xff]  ;;  %v415_v25 = vld [vmem:[#allocation3 + $0x1b0] sm:$0xff]  ;;  %v416_v27 = vld [vmem:[#allocation3 + $0x1b8] sm:$0xff] }
  0xa7   : > { %v407_v28 = vld [vmem:[#allocation3 + $0x170] sm:$0xff]  ;;  %v417_v29 = vld [vmem:[#allocation3 + $0x1c0] sm:$0xff]  ;;  %v408_v30 = vld [vmem:[#allocation3 + $0x178] sm:$0xff]  ;;  %v2680_v32 = vpack.c.bf16 %v415_v25, %v405_v24  ;;  %v2682_v33 = vpack.c.bf16 %v416_v27, %v406_v26 }
  0xa8   : > { %1205 = vmatpush.bf16.msra.mxu0 %v931_v63  ;;  %1292 = vmatpush.bf16.msra.mxu3 %v820_v4  ;;  %v418_v31 = vld [vmem:[#allocation3 + $0x1c8] sm:$0xff]  ;;  %v2684_v34 = vpack.c.bf16 %v417_v29, %v407_v28  ;;  %v640_v41 = vld [vmem:[#allocation6 + $0x4f8] sm:$0xff]  ;;  %v425_v61 = vld [vmem:[#allocation3 + $0x200] sm:$0xff] }
  0xa9   : > { %1234 = vmatpush.bf16.msra.mxu1 %v947_v8  ;;  %v2686_v35 = vpack.c.bf16 %v418_v31, %v408_v30  ;;  %v638_v40 = vld [vmem:[#allocation6 + $0x4e8] sm:$0xff]  ;;  %v576_v52 = vld [vmem:[#allocation6 + $0x2f8] sm:$0xff]  ;;  %v435_v62 = vld [vmem:[#allocation3 + $0x250] sm:$0xff] }
  0xaa   : > { %1120 = vmatmul.bf16.vlgmr.msrb.gmra.mxu1 %v2658_v1  ;;  %1264 = vmatpush.bf16.msra.mxu2 %v802_v12  ;;  %v574_v42 = vld [vmem:[#allocation6 + $0x2e8] sm:$0xff]  ;;  %v880_v43 = vpack.c.bf16 %v640_v41, %v638_v40  ;;  %v672_v58 = vld [vmem:[#allocation6 + $0x5f8] sm:$0xff]  ;;  %v427_v15 = vld [vmem:[#allocation3 + $0x210] sm:$0xff]  ;;  %v2692_v25 = vpack.c.bf16 %v435_v62, %v425_v61 }
  0xab   : > { %v670_v55 = vld [vmem:[#allocation6 + $0x5e8] sm:$0xff]  ;;  %v848_v59 = vpack.c.bf16 %v576_v52, %v574_v42  ;;  %v608_v4 = vld [vmem:[#allocation6 + $0x3f8] sm:$0xff]  ;;  %v437_v20 = vld [vmem:[#allocation3 + $0x260] sm:$0xff] }
  0xac   : > { %1206 = vmatpush.bf16.msra.mxu0 %v929_v13  ;;  %1293 = vmatpush.bf16.msra.mxu3 %v818_v21  ;;  %v896_v60 = vpack.c.bf16 %v672_v58, %v670_v55  ;;  %v606_v63 = vld [vmem:[#allocation6 + $0x3e8] sm:$0xff]  ;;  %v636_v8 = vld [vmem:[#allocation6 + $0x4d8] sm:$0xff]  ;;  %v2696_v27 = vpack.c.bf16 %v437_v20, %v427_v15  ;;  %v2704_v61 = vld [vmem:[#allocation8] sm:$0x3] }
  0xad   : > { %1178 = vmatmul.bf16.vlgmr.msrb.gmra.mxu3 %v2662_v3  ;;  %1235 = vmatpush.bf16.msra.mxu1 %v945_v23  ;;  %v426_v5 = vld [vmem:[#allocation3 + $0x208] sm:$0xff]  ;;  %v864_v6 = vpack.c.bf16 %v608_v4, %v606_v63  ;;  %v572_v11 = vld [vmem:[#allocation6 + $0x2d8] sm:$0xff]  ;;  %v369_v62 = vld [vmem:[#allocation3 + $0x40] sm:$0xff] }
  0xae   : > { %1091 = vmatmul.bf16.vlgmr.msrb.gmra.mxu0 %v2656_v0  ;;  %v634_v7 = vld [vmem:[#allocation6 + $0x4c8] sm:$0xff]  ;;  %v668_v13 = vld [vmem:[#allocation6 + $0x5d8] sm:$0xff]  ;;  %v379_v63 = vld [vmem:[#allocation3 + $0x90] sm:$0xff] }
  0xaf   : > { %1149 = vmatmul.bf16.vlgmr.msrb.gmra.mxu2 %v2660_v2  ;;  %v570_v9 = vld [vmem:[#allocation6 + $0x2c8] sm:$0xff]  ;;  %v878_v10 = vpack.c.bf16 %v636_v8, %v634_v7  ;;  %v436_v14 = vld [vmem:[#allocation3 + $0x258] sm:$0xff] }
  0xb0   : > { %1373 = vmatpush.bf16.msrb.mxu2 %v880_v43  ;;  %1315 = vmatpush.bf16.msrb.mxu0 %v848_v59  ;;  %v666_v12 = vld [vmem:[#allocation6 + $0x5c8] sm:$0xff]  ;;  %v846_v21 = vpack.c.bf16 %v572_v11, %v570_v9  ;;  %v428_v23 = vld [vmem:[#allocation3 + $0x218] sm:$0xff]  ;;  %v2694_v26 = vpack.c.bf16 %v436_v14, %v426_v5  ;;  %v2707_v14 = vperm.slane %v2704_v61, 0 }
  0xb1   : > { %1402 = vmatpush.bf16.msrb.mxu3 %v896_v60  ;;  %1344 = vmatpush.bf16.msrb.mxu1 %v864_v6  ;;  %v894_v22 = vpack.c.bf16 %v668_v13, %v666_v12  ;;  %v438_v24 = vld [vmem:[#allocation3 + $0x268] sm:$0xff]  ;;  %v604_v30 = vld [vmem:[#allocation6 + $0x3d8] sm:$0xff] }
  0xb2   : > { %v2698_v28 = vpack.c.bf16 %v438_v24, %v428_v23  ;;  %v602_v29 = vld [vmem:[#allocation6 + $0x3c8] sm:$0xff]  ;;  %v632_v41 = vld [vmem:[#allocation6 + $0x4b8] sm:$0xff]  ;;  %v2709_v23 = vpack.c.bf16 %v379_v63, %v369_v62 }
  0xb3   : > { %v862_v31 = vpack.c.bf16 %v604_v30, %v602_v29  ;;  %v630_v40 = vld [vmem:[#allocation6 + $0x4a8] sm:$0xff]  ;;  %v568_v52 = vld [vmem:[#allocation6 + $0x2b8] sm:$0xff] }
  0xb4   : > { %1374 = vmatpush.bf16.msrb.mxu2 %v878_v10  ;;  %1316 = vmatpush.bf16.msrb.mxu0 %v846_v21  ;;  %v566_v42 = vld [vmem:[#allocation6 + $0x2a8] sm:$0xff]  ;;  %v876_v43 = vpack.c.bf16 %v632_v41, %v630_v40  ;;  %v664_v58 = vld [vmem:[#allocation6 + $0x5b8] sm:$0xff] }
  0xb5   : > { %1403 = vmatpush.bf16.msrb.mxu3 %v894_v22  ;;  %1345 = vmatpush.bf16.msrb.mxu1 %v862_v31  ;;  %v662_v55 = vld [vmem:[#allocation6 + $0x5a8] sm:$0xff]  ;;  %v844_v59 = vpack.c.bf16 %v568_v52, %v566_v42  ;;  %v600_v5 = vld [vmem:[#allocation6 + $0x3b8] sm:$0xff] }
  0xb6   : > { %v892_v60 = vpack.c.bf16 %v664_v58, %v662_v55  ;;  %v598_v4 = vld [vmem:[#allocation6 + $0x3a8] sm:$0xff]  ;;  %v628_v8 = vld [vmem:[#allocation6 + $0x498] sm:$0xff] }
  0xb7   : > { %v860_v6 = vpack.c.bf16 %v600_v5, %v598_v4  ;;  %v626_v7 = vld [vmem:[#allocation6 + $0x488] sm:$0xff]  ;;  %v564_v11 = vld [vmem:[#allocation6 + $0x298] sm:$0xff] }
  0xb8   : > { %1375 = vmatpush.bf16.msrb.mxu2 %v876_v43  ;;  %1317 = vmatpush.bf16.msrb.mxu0 %v844_v59  ;;  %v562_v9 = vld [vmem:[#allocation6 + $0x288] sm:$0xff]  ;;  %v874_v10 = vpack.c.bf16 %v628_v8, %v626_v7  ;;  %v660_v13 = vld [vmem:[#allocation6 + $0x598] sm:$0xff] }
  0xb9   : > { %1404 = vmatpush.bf16.msrb.mxu3 %v892_v60  ;;  %v658_v12 = vld [vmem:[#allocation6 + $0x588] sm:$0xff]  ;;  %v380_v20 = vld [vmem:[#allocation3 + $0x98] sm:$0xff]  ;;  %1346 = vmatpush.bf16.msrb.mxu1 %v860_v6  ;;  %v842_v21 = vpack.c.bf16 %v564_v11, %v562_v9  ;;  %v389_v11 = vld [vmem:[#allocation3 + $0xe0] sm:$0xff] }
  0xba   : > { %1125 = vmatmul.bf16.gmra.mxu1 %v2670_v46  ;;  %v370_v15 = vld [vmem:[#allocation3 + $0x48] sm:$0xff]  ;;  %v890_v22 = vpack.c.bf16 %v660_v13, %v658_v12  ;;  %v596_v41 = vld [vmem:[#allocation6 + $0x398] sm:$0xff]  ;;  %v399_v12 = vld [vmem:[#allocation3 + $0x130] sm:$0xff] }
  0xbb   : > { %v2711_v29 = vpack.c.bf16 %v380_v20, %v370_v15  ;;  %v594_v40 = vld [vmem:[#allocation6 + $0x388] sm:$0xff]  ;;  %v624_v55 = vld [vmem:[#allocation6 + $0x478] sm:$0xff] }
  0xbc   : > { %1376 = vmatpush.bf16.msrb.mxu2 %v874_v10  ;;  %1318 = vmatpush.bf16.msrb.mxu0 %v842_v21  ;;  %v858_v43 = vpack.c.bf16 %v596_v41, %v594_v40  ;;  %v622_v52 = vld [vmem:[#allocation6 + $0x468] sm:$0xff]  ;;  %v560_v60 = vld [vmem:[#allocation6 + $0x278] sm:$0xff] }
  0xbd   : > { %1183 = vmatmul.bf16.gmra.mxu3 %v2674_v49  ;;  %v558_v58 = vld [vmem:[#allocation6 + $0x268] sm:$0xff]  ;;  %v872_v59 = vpack.c.bf16 %v624_v55, %v622_v52  ;;  %v656_v63 = vld [vmem:[#allocation6 + $0x578] sm:$0xff] }
  0xbe   : > { %1096 = vmatmul.bf16.gmra.mxu0 %v2668_v45  ;;  %1405 = vmatpush.bf16.msrb.mxu3 %v890_v22  ;;  %v654_v62 = vld [vmem:[#allocation6 + $0x568] sm:$0xff]  ;;  %v840_v5 = vpack.c.bf16 %v560_v60, %v558_v58  ;;  %v592_v15 = vld [vmem:[#allocation6 + $0x378] sm:$0xff]  ;;  %v2721_v60 = vpack.c.bf16 %v399_v12, %v389_v11 }
  0xbf   : > { %1154 = vmatmul.bf16.gmra.mxu2 %v2672_v47  ;;  %1347 = vmatpush.bf16.msrb.mxu1 %v858_v43  ;;  %v888_v6 = vpack.c.bf16 %v656_v63, %v654_v62  ;;  %v590_v13 = vld [vmem:[#allocation6 + $0x368] sm:$0xff]  ;;  %v556_v40 = vld [vmem:[#allocation6 + $0x258] sm:$0xff] }
  0xc0   : > { %1377 = vmatpush.bf16.msrb.mxu2 %v872_v59  ;;  %1319 = vmatpush.bf16.msrb.mxu0 %v840_v5  ;;  %v856_v21 = vpack.c.bf16 %v592_v15, %v590_v13  ;;  %v618_v22 = vld [vmem:[#allocation6 + $0x448] sm:$0xff]  ;;  %v400_v52 = vld [vmem:[#allocation3 + $0x138] sm:$0xff] }
  0xc1   : > { %v650_v41 = vld [vmem:[#allocation6 + $0x548] sm:$0xff]  ;;  %v616_v12 = vld [vmem:[#allocation6 + $0x438] sm:$0xff] }
  0xc2   : > { %1406 = vmatpush.bf16.msrb.mxu3 %v888_v6  ;;  %v390_v43 = vld [vmem:[#allocation3 + $0xe8] sm:$0xff] }
  0xc3   : > { %1348 = vmatpush.bf16.msrb.mxu1 %v856_v21  ;;  %v2723_v5 = vpack.c.bf16 %v400_v52, %v390_v43  ;;  %v614_v11 = vld [vmem:[#allocation6 + $0x428] sm:$0xff]  ;;  %v552_v21 = vld [vmem:[#allocation6 + $0x238] sm:$0xff] }
  0xc4   : > { %v550_v15 = vld [vmem:[#allocation6 + $0x228] sm:$0xff] }
  0xca   : > { %1130 = vmatmul.bf16.gmra.mxu1 %v2682_v33 }
  0xcd   : > { %1188 = vmatmul.bf16.gmra.mxu3 %v2686_v35 }
  0xce   : > { %1101 = vmatmul.bf16.gmra.mxu0 %v2680_v32 }
  0xcf   : > { %1159 = vmatmul.bf16.gmra.mxu2 %v2684_v34 }
  0xda   : > { %1135 = vmatmul.bf16.gmra.mxu1 %v2694_v26 }
  0xdd   : > { %1193 = vmatmul.bf16.gmra.mxu3 %v2698_v28 }
  0xde   : > { %1106 = vmatmul.bf16.gmra.mxu0 %v2692_v25 }
  0xdf   : > { %1164 = vmatmul.bf16.gmra.mxu2 %v2696_v27 }
  0xe7   : > { %v976_v24 = vpop.f32.mrf.mxu0  ;;  %v1005_v31 = vpop.f32.mrf.mxu1 }
  0xe8   : > { %v977_v30 = vadd.f32 %v976_v24, %v2707_v14  ;;  %v620_v24 = vld [vmem:[#allocation6 + $0x458] sm:$0xff] }
  0xea   : > { %v1006_v42 = vadd.f32 %v1005_v31, %v977_v30  ;;  %1236 = vmatmul.bf16.vlgmr.msra.gmra.mxu1 %v2711_v29  ;;  %v554_v30 = vld [vmem:[#allocation6 + $0x248] sm:$0xff]  ;;  %v870_v31 = vpack.c.bf16 %v620_v24, %v618_v22  ;;  %v648_v24 = vld [vmem:[#allocation6 + $0x538] sm:$0xff] }
  0xeb   : > { %v838_v55 = vpack.c.bf16 %v556_v40, %v554_v30  ;;  %v646_v22 = vld [vmem:[#allocation6 + $0x528] sm:$0xff] }
  0xec   : > { %1378 = vmatpush.bf16.msrb.mxu2 %v870_v31  ;;  %v836_v31 = vpack.c.bf16 %v552_v21, %v550_v15  ;;  %v884_v40 = vpack.c.bf16 %v648_v24, %v646_v22  ;;  %v420_v15 = vld [vmem:[#allocation3 + $0x1d8] sm:$0xff] }
  0xed   : > { %1294 = vmatmul.bf16.vlgmr.msra.gmra.mxu3 %v2610_v53  ;;  %1320 = vmatpush.bf16.msrb.mxu0 %v838_v55  ;;  %v409_v55 = vld [vmem:[#allocation3 + $0x180] sm:$0xff] }
  0xee   : > { %1207 = vmatmul.bf16.vlgmr.msra.gmra.mxu0 %v2709_v23 }
  0xef   : > { %1265 = vmatmul.bf16.vlgmr.msra.gmra.mxu2 %v2608_v48  ;;  %v1063_v8 = vpop.f32.mrf.mxu3  ;;  %v978_v9 = vpop.f32.mrf.mxu0 }
  0xf0   : > { %v1034_v4 = vpop.f32.mrf.mxu2  ;;  %v979_v10 = vadd.f32 %v978_v9, %v2707_v14  ;;  %v1007_v48 = vpop.f32.mrf.mxu1  ;;  %v586_v9 = vld [vmem:[#allocation6 + $0x348] sm:$0xff] }
  0xf1   : > { %v1035_v7 = vadd.f32 %v1034_v4, %v1006_v42  ;;  %v652_v42 = vld [vmem:[#allocation6 + $0x558] sm:$0xff]  ;;  %1321 = vmatpush.bf16.msrb.mxu0 %v836_v31 }
  0xf2   : > { %v1008_v20 = vadd.f32 %v1007_v48, %v979_v10  ;;  %v886_v58 = vpack.c.bf16 %v652_v42, %v650_v41  ;;  %v588_v10 = vld [vmem:[#allocation6 + $0x358] sm:$0xff] }
  0xf3   : > { %v2719_v53 = vadd.f32 %v1063_v8, %v1035_v7  ;;  %v854_v13 = vpack.c.bf16 %v588_v10, %v586_v9  ;;  %v546_v9 = vld [vmem:[#allocation6 + $0x208] sm:$0xff]  ;;  %v580_v31 = vld [vmem:[#allocation6 + $0x318] sm:$0xff] }
  0xf4   : > { %1407 = vmatpush.bf16.msrb.mxu3 %v886_v58  ;;  %v419_v58 = vld [vmem:[#allocation3 + $0x1d0] sm:$0xff] }
  0xf5   : > { %1349 = vmatpush.bf16.msrb.mxu1 %v854_v13  ;;  %v642_v13 = vld [vmem:[#allocation6 + $0x508] sm:$0xff]  ;;  %v2735_v24 = vpack.c.bf16 %v419_v58, %v409_v55  ;;  %v768_v58 = vld [vmem:[#allocation6 + $0x8f8] sm:$0xff] }
  0xf6   : > { %v766_v55 = vld [vmem:[#allocation6 + $0x8e8] sm:$0xff] }
  0xf7   : > { %v1065_v63 = vpop.f32.mrf.mxu3  ;;  %v981_v4 = vpop.f32.mrf.mxu0 }
  0xf8   : > { %v1036_v59 = vpop.f32.mrf.mxu2  ;;  %v982_v6 = vadd.f32 %v981_v4, %v2707_v14  ;;  %v1010_v7 = vpop.f32.mrf.mxu1  ;;  %1408 = vmatpush.bf16.msrb.mxu3 %v884_v40 }
  0xf9   : > { %v1037_v62 = vadd.f32 %v1036_v59, %v1008_v20  ;;  %v868_v20 = vpack.c.bf16 %v616_v12, %v614_v11  ;;  %v582_v59 = vld [vmem:[#allocation6 + $0x328] sm:$0xff]  ;;  %v644_v11 = vld [vmem:[#allocation6 + $0x518] sm:$0xff] }
  0xfa   : > { %v1011_v48 = vadd.f32 %v1010_v7, %v982_v6  ;;  %1241 = vmatmul.bf16.gmra.mxu1 %v2723_v5  ;;  %v610_v6 = vld [vmem:[#allocation6 + $0x408] sm:$0xff]  ;;  %v612_v7 = vld [vmem:[#allocation6 + $0x418] sm:$0xff]  ;;  %v882_v21 = vpack.c.bf16 %v644_v11, %v642_v13 }
  0xfb   : > { %v2726_v8 = vadd.f32 %v1065_v63, %v1037_v62  ;;  %1379 = vmatpush.bf16.msrb.mxu2 %v868_v20  ;;  %v584_v62 = vld [vmem:[#allocation6 + $0x338] sm:$0xff]  ;;  %v866_v10 = vpack.c.bf16 %v612_v7, %v610_v6  ;;  %v410_v12 = vld [vmem:[#allocation3 + $0x188] sm:$0xff]  ;;  %v944_v6 = vpack.c.bf16 %v768_v58, %v766_v55 }
  0xfc   : > { %v852_v4 = vpack.c.bf16 %v584_v62, %v582_v59  ;;  %1409 = vmatpush.bf16.msrb.mxu3 %v882_v21  ;;  %v704_v7 = vld [vmem:[#allocation6 + $0x6f8] sm:$0xff]  ;;  %v794_v58 = vld [vmem:[#allocation6 + $0x9c8] sm:$0xff] }
  0xfd   : > { %1299 = vmatmul.bf16.gmra.mxu3 %v2622_v50  ;;  %v700_v55 = vld [vmem:[#allocation6 + $0x6d8] sm:$0xff] }
  0xfe   : > { %1212 = vmatmul.bf16.gmra.mxu0 %v2721_v60  ;;  %1350 = vmatpush.bf16.msrb.mxu1 %v852_v4 }
  0xff   : > { %1270 = vmatmul.bf16.gmra.mxu2 %v2620_v44  ;;  %v1068_v42 = vpop.f32.mrf.mxu3  ;;  %v983_v43 = vpop.f32.mrf.mxu0 }
 0x100   : > { %v984_v52 = vadd.f32 %v983_v43, %v2707_v14  ;;  %v1012_v44 = vpop.f32.mrf.mxu1  ;;  %1380 = vmatpush.bf16.msrb.mxu2 %v866_v10  ;;  %v2737_v43 = vpack.c.bf16 %v420_v15, %v410_v12  ;;  %v800_v10 = vld [vmem:[#allocation6 + $0x9f8] sm:$0xff] }
 0x102   : > { %v1039_v30 = vpop.f32.mrf.mxu2  ;;  %v1013_v63 = vadd.f32 %v1012_v44, %v984_v52 }
 0x103   : > { %v1040_v41 = vadd.f32 %v1039_v30, %v1011_v48  ;;  %v548_v48 = vld [vmem:[#allocation6 + $0x218] sm:$0xff]  ;;  %v578_v30 = vld [vmem:[#allocation6 + $0x308] sm:$0xff] }
 0x104   : > { %v834_v20 = vpack.c.bf16 %v548_v48, %v546_v9  ;;  %v850_v52 = vpack.c.bf16 %v580_v31, %v578_v30  ;;  %v798_v9 = vld [vmem:[#allocation6 + $0x9e8] sm:$0xff]  ;;  %1489 = vmatpush.bf16.msra.mxu2 %v944_v6  ;;  %v439_v30 = vld [vmem:[#allocation3 + $0x270] sm:$0xff] }
 0x105   : > { %v2733_v50 = vadd.f32 %v1068_v42, %v1040_v41  ;;  %v960_v11 = vpack.c.bf16 %v800_v10, %v798_v9  ;;  %v734_v31 = vld [vmem:[#allocation6 + $0x7e8] sm:$0xff] }
 0x106   : > { %1322 = vmatpush.bf16.msrb.mxu0 %v834_v20  ;;  %1351 = vmatpush.bf16.msrb.mxu1 %v850_v52  ;;  %v762_v52 = vld [vmem:[#allocation6 + $0x8c8] sm:$0xff] }
 0x107   : > { %v1070_v41 = vpop.f32.mrf.mxu3  ;;  %1518 = vmatpush.bf16.msra.mxu3 %v960_v11  ;;  %v430_v6 = vld [vmem:[#allocation3 + $0x228] sm:$0xff] }
 0x108   : > { %v1015_v59 = vpop.f32.mrf.mxu1 }
 0x10a   : > { %v1041_v22 = vpop.f32.mrf.mxu2  ;;  %1246 = vmatmul.bf16.gmra.mxu1 %v2737_v43 }
 0x10b   : > { %v1042_v40 = vadd.f32 %v1041_v22, %v1013_v63  ;;  %v986_v42 = vpop.f32.mrf.mxu0  ;;  %v702_v63 = vld [vmem:[#allocation6 + $0x6e8] sm:$0xff] }
 0x10c   : > { %v987_v44 = vadd.f32 %v986_v42, %v2707_v14  ;;  %v912_v13 = vpack.c.bf16 %v704_v7, %v702_v63  ;;  %v796_v63 = vld [vmem:[#allocation6 + $0x9d8] sm:$0xff] }
 0x10d   : > { %v2740_v62 = vadd.f32 %v1070_v41, %v1042_v40  ;;  %1304 = vmatmul.bf16.gmra.mxu3 %v2634_v37  ;;  %v429_v37 = vld [vmem:[#allocation3 + $0x220] sm:$0xff]  ;;  %v736_v40 = vld [vmem:[#allocation6 + $0x7f8] sm:$0xff]  ;;  %v958_v10 = vpack.c.bf16 %v796_v63, %v794_v58 }
 0x10e   : > { %v1016_v4 = vadd.f32 %v1015_v59, %v987_v44  ;;  %1217 = vmatmul.bf16.gmra.mxu0 %v2735_v24  ;;  %v928_v42 = vpack.c.bf16 %v736_v40, %v734_v31  ;;  %v764_v44 = vld [vmem:[#allocation6 + $0x8d8] sm:$0xff]  ;;  %v698_v59 = vld [vmem:[#allocation6 + $0x6c8] sm:$0xff] }
 0x10f   : > { %1275 = vmatmul.bf16.gmra.mxu2 %v2632_v36  ;;  %1431 = vmatpush.bf16.msra.mxu0 %v912_v13  ;;  %v440_v7 = vld [vmem:[#allocation3 + $0x278] sm:$0xff]  ;;  %v910_v9 = vpack.c.bf16 %v700_v55, %v698_v59  ;;  %v2749_v13 = vpack.c.bf16 %v439_v30, %v429_v37  ;;  %v730_v40 = vld [vmem:[#allocation6 + $0x7c8] sm:$0xff] }
 0x110   : > { %v1073_v15 = vpop.f32.mrf.mxu3  ;;  %v1017_v22 = vpop.f32.mrf.mxu1  ;;  %1460 = vmatpush.bf16.msra.mxu1 %v928_v42  ;;  %1519 = vmatpush.bf16.msra.mxu3 %v958_v10  ;;  %v732_v42 = vld [vmem:[#allocation6 + $0x7d8] sm:$0xff]  ;;  %v758_v37 = vld [vmem:[#allocation6 + $0x8a8] sm:$0xff] }
 0x111   : > { %v760_v30 = vld [vmem:[#allocation6 + $0x8b8] sm:$0xff]  ;;  %v790_v55 = vld [vmem:[#allocation6 + $0x9a8] sm:$0xff] }
 0x112   : > { %v1044_v48 = vpop.f32.mrf.mxu2  ;;  %v940_v59 = vpack.c.bf16 %v760_v30, %v758_v37  ;;  %v792_v58 = vld [vmem:[#allocation6 + $0x9b8] sm:$0xff] }
 0x113   : > { %v1045_v12 = vadd.f32 %v1044_v48, %v1016_v4  ;;  %v988_v20 = vpop.f32.mrf.mxu0  ;;  %v942_v4 = vpack.c.bf16 %v764_v44, %v762_v52  ;;  %1432 = vmatpush.bf16.msra.mxu0 %v910_v9  ;;  %v926_v44 = vpack.c.bf16 %v732_v42, %v730_v40  ;;  %v754_v40 = vld [vmem:[#allocation6 + $0x888] sm:$0xff]  ;;  %v756_v42 = vld [vmem:[#allocation6 + $0x898] sm:$0xff] }
 0x114   : > { %v989_v21 = vadd.f32 %v988_v20, %v2707_v14  ;;  %v2751_v20 = vpack.c.bf16 %v440_v7, %v430_v6  ;;  %v956_v7 = vpack.c.bf16 %v792_v58, %v790_v55  ;;  %v938_v37 = vpack.c.bf16 %v756_v42, %v754_v40  ;;  %v692_v30 = vld [vmem:[#allocation6 + $0x698] sm:$0xff]  ;;  %v782_v40 = vld [vmem:[#allocation6 + $0x968] sm:$0xff] }
 0x115   : > { %v2747_v36 = vadd.f32 %v1073_v15, %v1045_v12  ;;  %1490 = vmatpush.bf16.msra.mxu2 %v942_v4  ;;  %1461 = vmatpush.bf16.msra.mxu1 %v926_v44  ;;  %v696_v4 = vld [vmem:[#allocation6 + $0x6b8] sm:$0xff]  ;;  %v690_v44 = vld [vmem:[#allocation6 + $0x688] sm:$0xff] }
 0x116   : > { %v1018_v41 = vadd.f32 %v1017_v22, %v989_v21  ;;  %1520 = vmatpush.bf16.msra.mxu3 %v956_v7  ;;  %v784_v42 = vld [vmem:[#allocation6 + $0x978] sm:$0xff] }
 0x118   : > { %v1075_v12 = vpop.f32.mrf.mxu3  ;;  %v1020_v22 = vpop.f32.mrf.mxu1 }
 0x119   : > { %1491 = vmatpush.bf16.msra.mxu2 %v940_v59  ;;  %v906_v59 = vpack.c.bf16 %v692_v30, %v690_v44  ;;  %v952_v30 = vpack.c.bf16 %v784_v42, %v782_v40 }
 0x11a   : > { %v1046_v48 = vpop.f32.mrf.mxu2  ;;  %1251 = vmatmul.bf16.gmra.mxu1 %v2751_v20 }
 0x11b   : > { %v1047_v11 = vadd.f32 %v1046_v48, %v1018_v41  ;;  %v991_v15 = vpop.f32.mrf.mxu0  ;;  %v694_v41 = vld [vmem:[#allocation6 + $0x6a8] sm:$0xff] }
 0x11c   : > { %v992_v21 = vadd.f32 %v991_v15, %v2707_v14  ;;  %v908_v6 = vpack.c.bf16 %v696_v4, %v694_v41  ;;  %v728_v15 = vld [vmem:[#allocation6 + $0x7b8] sm:$0xff] }
 0x11d   : > { %v2754_v31 = vadd.f32 %v1075_v12, %v1047_v11  ;;  %1309 = vmatmul.bf16.gmra.mxu3 %v2646_v17  ;;  %v726_v12 = vld [vmem:[#allocation6 + $0x7a8] sm:$0xff]  ;;  %v788_v41 = vld [vmem:[#allocation6 + $0x998] sm:$0xff]  ;;  %1492 = vmatpush.bf16.msra.mxu2 %v938_v37 }
 0x11e   : > { %v1021_v52 = vadd.f32 %v1020_v22, %v992_v21  ;;  %1222 = vmatmul.bf16.gmra.mxu0 %v2749_v13  ;;  %v924_v22 = vpack.c.bf16 %v728_v15, %v726_v12  ;;  %v750_v12 = vld [vmem:[#allocation6 + $0x868] sm:$0xff]  ;;  %v752_v15 = vld [vmem:[#allocation6 + $0x878] sm:$0xff] }
 0x11f   : > { %1280 = vmatmul.bf16.gmra.mxu2 %v2644_v16  ;;  %1433 = vmatpush.bf16.msra.mxu0 %v908_v6 }
 0x120   : > { %v1078_v10 = vpop.f32.mrf.mxu3  ;;  %v1022_v16 = vpop.f32.mrf.mxu1  ;;  %1462 = vmatpush.bf16.msra.mxu1 %v924_v22  ;;  %v688_v22 = vld [vmem:[#allocation6 + $0x678] sm:$0xff] }
 0x122   : > { %v1049_v63 = vpop.f32.mrf.mxu2 }
 0x123   : > { %v1050_v9 = vadd.f32 %v1049_v63, %v1021_v52  ;;  %v993_v48 = vpop.f32.mrf.mxu0  ;;  %v786_v52 = vld [vmem:[#allocation6 + $0x988] sm:$0xff]  ;;  %1434 = vmatpush.bf16.msra.mxu0 %v906_v59 }
 0x124   : > { %v994_v11 = vadd.f32 %v993_v48, %v2707_v14  ;;  %v954_v4 = vpack.c.bf16 %v788_v41, %v786_v52  ;;  %v724_v48 = vld [vmem:[#allocation6 + $0x798] sm:$0xff]  ;;  %v718_v59 = vld [vmem:[#allocation6 + $0x768] sm:$0xff] }
 0x125   : > { %v2761_v17 = vadd.f32 %v1078_v10, %v1050_v9  ;;  %v722_v10 = vld [vmem:[#allocation6 + $0x788] sm:$0xff] }
 0x126   : > { %v1023_v21 = vadd.f32 %v1022_v16, %v994_v11  ;;  %1521 = vmatpush.bf16.msra.mxu3 %v954_v4  ;;  %v922_v16 = vpack.c.bf16 %v724_v48, %v722_v10  ;;  %v720_v4 = vld [vmem:[#allocation6 + $0x778] sm:$0xff]  ;;  %v778_v48 = vld [vmem:[#allocation6 + $0x948] sm:$0xff] }
 0x127   : > { %v684_v10 = vld [vmem:[#allocation6 + $0x658] sm:$0xff] }
 0x128   : > { %v1080_v58 = vpop.f32.mrf.mxu3  ;;  %v1121_v7 = vpop.f32.mrf.mxu1  ;;  %1463 = vmatpush.bf16.msra.mxu1 %v922_v16 }
 0x12a   : > { %v1051_v14 = vpop.f32.mrf.mxu2  ;;  %1352 = vmatmul.bf16.vlgmr.msrb.gmra.mxu1 %v2614_v57  ;;  %1522 = vmatpush.bf16.msra.mxu3 %v952_v30 }
 0x12b   : > { %v1052_v55 = vadd.f32 %v1051_v14, %v1023_v21  ;;  %v1092_v63 = vpop.f32.mrf.mxu0  ;;  %v686_v21 = vld [vmem:[#allocation6 + $0x668] sm:$0xff] }
 0x12c   : > { %v1093_v6 = vadd.f32 %v1092_v63, %v2719_v53  ;;  %v936_v53 = vpack.c.bf16 %v752_v15, %v750_v12  ;;  %v904_v37 = vpack.c.bf16 %v688_v22, %v686_v21  ;;  %v748_v63 = vld [vmem:[#allocation6 + $0x858] sm:$0xff] }
 0x12d   : > { %v2764_v9 = vadd.f32 %v1080_v58, %v1052_v55  ;;  %1410 = vmatmul.bf16.vlgmr.msrb.gmra.mxu3 %v2658_v1  ;;  %v920_v55 = vpack.c.bf16 %v720_v4, %v718_v59  ;;  %v746_v58 = vld [vmem:[#allocation6 + $0x848] sm:$0xff]  ;;  %v776_v4 = vld [vmem:[#allocation6 + $0x938] sm:$0xff] }
 0x12e   : > { %v1122_v11 = vadd.f32 %v1121_v7, %v1093_v6  ;;  %1323 = vmatmul.bf16.vlgmr.msrb.gmra.mxu0 %v2612_v54  ;;  %1493 = vmatpush.bf16.msra.mxu2 %v936_v53  ;;  %v682_v6 = vld [vmem:[#allocation6 + $0x648] sm:$0xff]  ;;  %v934_v7 = vpack.c.bf16 %v748_v63, %v746_v58 }
 0x12f   : > { %1381 = vmatmul.bf16.vlgmr.msrb.gmra.mxu2 %v2656_v0  ;;  %1435 = vmatpush.bf16.msra.mxu0 %v904_v37  ;;  %v902_v16 = vpack.c.bf16 %v684_v10, %v682_v6  ;;  %v716_v37 = vld [vmem:[#allocation6 + $0x758] sm:$0xff]  ;;  %v774_v59 = vld [vmem:[#allocation6 + $0x928] sm:$0xff] }
 0x130   : > { %v1179_v54 = vpop.f32.mrf.mxu3  ;;  %v1123_v0 = vpop.f32.mrf.mxu1  ;;  %1464 = vmatpush.bf16.msra.mxu1 %v920_v55  ;;  %v948_v58 = vpack.c.bf16 %v776_v4, %v774_v59  ;;  %v712_v10 = vld [vmem:[#allocation6 + $0x738] sm:$0xff] }
 0x132   : > { %v1150_v44 = vpop.f32.mrf.mxu2  ;;  %1494 = vmatpush.bf16.msra.mxu2 %v934_v7  ;;  %v710_v7 = vld [vmem:[#allocation6 + $0x728] sm:$0xff] }
 0x133   : > { %v1151_v52 = vadd.f32 %v1150_v44, %v1122_v11  ;;  %v1094_v41 = vpop.f32.mrf.mxu0  ;;  %v780_v11 = vld [vmem:[#allocation6 + $0x958] sm:$0xff]  ;;  %1436 = vmatpush.bf16.msra.mxu0 %v902_v16  ;;  %v714_v44 = vld [vmem:[#allocation6 + $0x748] sm:$0xff] }
 0x134   : > { %v1095_v57 = vadd.f32 %v1094_v41, %v2726_v8  ;;  %v950_v12 = vpack.c.bf16 %v780_v11, %v778_v48  ;;  %v744_v41 = vld [vmem:[#allocation6 + $0x838] sm:$0xff]  ;;  %v916_v11 = vpack.c.bf16 %v712_v10, %v710_v7  ;;  %v738_v16 = vld [vmem:[#allocation6 + $0x808] sm:$0xff] }
 0x135   : > { %v2771_v1 = vadd.f32 %v1179_v54, %v1151_v52  ;;  %v918_v52 = vpack.c.bf16 %v716_v37, %v714_v44  ;;  %v742_v54 = vld [vmem:[#allocation6 + $0x828] sm:$0xff] }
 0x136   : > { %v1124_v14 = vadd.f32 %v1123_v0, %v1095_v57  ;;  %1523 = vmatpush.bf16.msra.mxu3 %v950_v12  ;;  %v678_v57 = vld [vmem:[#allocation6 + $0x628] sm:$0xff]  ;;  %v680_v0 = vld [vmem:[#allocation6 + $0x638] sm:$0xff] }
 0x137   : > { %1465 = vmatpush.bf16.msra.mxu1 %v918_v52  ;;  %v900_v55 = vpack.c.bf16 %v680_v0, %v678_v57  ;;  %v740_v12 = vld [vmem:[#allocation6 + $0x818] sm:$0xff]  ;;  %v706_v37 = vld [vmem:[#allocation6 + $0x708] sm:$0xff] }
 0x138   : > { %v1181_v21 = vpop.f32.mrf.mxu3  ;;  %v1126_v40 = vpop.f32.mrf.mxu1 }
 0x139   : > { %1437 = vmatpush.bf16.msra.mxu0 %v900_v55 }
 0x13a   : > { %v1152_v8 = vpop.f32.mrf.mxu2  ;;  %1357 = vmatmul.bf16.gmra.mxu1 %v2626_v56  ;;  %1524 = vmatpush.bf16.msra.mxu3 %v948_v58 }
 0x13b   : > { %v1153_v15 = vadd.f32 %v1152_v8, %v1124_v14  ;;  %v1097_v53 = vpop.f32.mrf.mxu0  ;;  %v674_v8 = vld [vmem:[#allocation6 + $0x608] sm:$0xff]  ;;  %1466 = vmatpush.bf16.msra.mxu1 %v916_v11 }
 0x13c   : > { %v1098_v22 = vadd.f32 %v1097_v53, %v2733_v50  ;;  %v932_v50 = vpack.c.bf16 %v744_v41, %v742_v54  ;;  %v770_v53 = vld [vmem:[#allocation6 + $0x908] sm:$0xff] }
 0x13d   : > { %v2774_v42 = vadd.f32 %v1181_v21, %v1153_v15  ;;  %1415 = vmatmul.bf16.gmra.mxu3 %v2670_v46  ;;  %v930_v15 = vpack.c.bf16 %v740_v12, %v738_v16  ;;  %v676_v21 = vld [vmem:[#allocation6 + $0x618] sm:$0xff] }
 0x13e   : > { %v1127_v30 = vadd.f32 %v1126_v40, %v1098_v22  ;;  %1328 = vmatmul.bf16.gmra.mxu0 %v2624_v51  ;;  %1495 = vmatpush.bf16.msra.mxu2 %v932_v50  ;;  %v772_v22 = vld [vmem:[#allocation6 + $0x918] sm:$0xff]  ;;  %v898_v40 = vpack.c.bf16 %v676_v21, %v674_v8 }
 0x13f   : > { %1386 = vmatmul.bf16.gmra.mxu2 %v2668_v45  ;;  %v946_v44 = vpack.c.bf16 %v772_v22, %v770_v53 }
 0x140   : > { %v1184_v51 = vpop.f32.mrf.mxu3  ;;  %v1128_v45 = vpop.f32.mrf.mxu1  ;;  %1438 = vmatpush.bf16.msra.mxu0 %v898_v40 }
 0x141   : > { %1525 = vmatpush.bf16.msra.mxu3 %v946_v44 }
 0x142   : > { %v1155_v14 = vpop.f32.mrf.mxu2  ;;  %1496 = vmatpush.bf16.msra.mxu2 %v930_v15 }
 0x143   : > { %v1156_v63 = vadd.f32 %v1155_v14, %v1127_v30  ;;  %v1099_v6 = vpop.f32.mrf.mxu0  ;;  %v708_v30 = vld [vmem:[#allocation6 + $0x718] sm:$0xff] }
 0x144   : > { %v1100_v56 = vadd.f32 %v1099_v6, %v2740_v62  ;;  %v914_v57 = vpack.c.bf16 %v708_v30, %v706_v37 }
 0x145   : > { %v2781_v46 = vadd.f32 %v1184_v51, %v1156_v63 }
 0x146   : > { %v1129_v48 = vadd.f32 %v1128_v45, %v1100_v56  ;;  %1467 = vmatpush.bf16.msra.mxu1 %v914_v57 }
 0x148   : > { %v1186_v54 = vpop.f32.mrf.mxu3  ;;  %v1131_v0 = vpop.f32.mrf.mxu1 }
 0x14a   : > { %v1157_v62 = vpop.f32.mrf.mxu2  ;;  %1362 = vmatmul.bf16.gmra.mxu1 %v2638_v39 }
 0x14b   : > { %v1158_v52 = vadd.f32 %v1157_v62, %v1129_v48  ;;  %v1102_v41 = vpop.f32.mrf.mxu0 }
 0x14c   : > { %v1103_v50 = vadd.f32 %v1102_v41, %v2747_v36 }
 0x14d   : > { %v2784_v59 = vadd.f32 %v1186_v54, %v1158_v52  ;;  %1420 = vmatmul.bf16.gmra.mxu3 %v2682_v33 }
 0x14e   : > { %v1132_v4 = vadd.f32 %v1131_v0, %v1103_v50  ;;  %1333 = vmatmul.bf16.gmra.mxu0 %v2636_v38 }
 0x14f   : > { %1391 = vmatmul.bf16.gmra.mxu2 %v2680_v32 }
 0x150   : > { %v1189_v58 = vpop.f32.mrf.mxu3  ;;  %v1133_v36 = vpop.f32.mrf.mxu1 }
 0x152   : > { %v1160_v14 = vpop.f32.mrf.mxu2 }
 0x153   : > { %v1161_v55 = vadd.f32 %v1160_v14, %v1132_v4  ;;  %v1104_v63 = vpop.f32.mrf.mxu0 }
 0x154   : > { %v1105_v51 = vadd.f32 %v1104_v63, %v2754_v31 }
 0x155   : > { %v2791_v6 = vadd.f32 %v1189_v58, %v1161_v55 }
 0x156   : > { %v1134_v56 = vadd.f32 %v1133_v36, %v1105_v51 }
 0x158   : > { %v1191_v10 = vpop.f32.mrf.mxu3  ;;  %v1136_v48 = vpop.f32.mrf.mxu1 }
 0x15a   : > { %v1162_v45 = vpop.f32.mrf.mxu2  ;;  %1367 = vmatmul.bf16.gmra.mxu1 %v2650_v19 }
 0x15b   : > { %v1163_v7 = vadd.f32 %v1162_v45, %v1134_v56  ;;  %v1107_v38 = vpop.f32.mrf.mxu0 }
 0x15c   : > { %v1108_v39 = vadd.f32 %v1107_v38, %v2761_v17 }
 0x15d   : > { %v2794_v32 = vadd.f32 %v1191_v10, %v1163_v7  ;;  %1425 = vmatmul.bf16.gmra.mxu3 %v2694_v26 }
 0x15e   : > { %v1137_v33 = vadd.f32 %v1136_v48, %v1108_v39  ;;  %1338 = vmatmul.bf16.gmra.mxu0 %v2648_v18 }
 0x15f   : > { %1396 = vmatmul.bf16.gmra.mxu2 %v2692_v25 }
 0x160   : > { %v1194_v16 = vpop.f32.mrf.mxu3  ;;  %v1138_v15 = vpop.f32.mrf.mxu1 }
 0x162   : > { %v1165_v31 = vpop.f32.mrf.mxu2 }
 0x163   : > { %v1166_v11 = vadd.f32 %v1165_v31, %v1137_v33  ;;  %v1109_v12 = vpop.f32.mrf.mxu0 }
 0x164   : > { %v1110_v8 = vadd.f32 %v1109_v12, %v2764_v9  ;;  %v2812_v9 = vperm.slane %v2704_v61, 1 }
 0x165   : > { %v2801_v17 = vadd.f32 %v1194_v16, %v1166_v11 }
 0x166   : > { %v1139_v21 = vadd.f32 %v1138_v15, %v1110_v8 }
 0x168   : > { %v1196_v40 = vpop.f32.mrf.mxu3  ;;  %v1237_v44 = vpop.f32.mrf.mxu1 }
 0x16a   : > { %v1167_v53 = vpop.f32.mrf.mxu2  ;;  %1468 = vmatmul.bf16.vlgmr.msra.gmra.mxu1 %v2662_v3 }
 0x16b   : > { %v1168_v22 = vadd.f32 %v1167_v53, %v1139_v21  ;;  %v1208_v18 = vpop.f32.mrf.mxu0 }
 0x16c   : > { %v1209_v19 = vadd.f32 %v1208_v18, %v2771_v1 }
 0x16d   : > { %v2804_v25 = vadd.f32 %v1196_v40, %v1168_v22  ;;  %1526 = vmatmul.bf16.vlgmr.msra.gmra.mxu3 %v2711_v29 }
 0x16e   : > { %v2806_v26 = vadd.f32 %v1237_v44, %v1209_v19  ;;  %1439 = vmatmul.bf16.vlgmr.msra.gmra.mxu0 %v2660_v2 }
 0x16f   : > { %1497 = vmatmul.bf16.vlgmr.msra.gmra.mxu2 %v2709_v23 }
 0x170   : > { %v1295_v1 = vpop.f32.mrf.mxu3  ;;  %v1239_v54 = vpop.f32.mrf.mxu1 }
 0x172   : > { %v1266_v62 = vpop.f32.mrf.mxu2 }
 0x173   : > { %v1267_v37 = vadd.f32 %v1266_v62, %v2812_v9  ;;  %v1210_v30 = vpop.f32.mrf.mxu0 }
 0x174   : > { %v1211_v52 = vadd.f32 %v1210_v30, %v2774_v42 }
 0x175   : > { %v2817_v41 = vadd.f32 %v1295_v1, %v1267_v37 }
 0x176   : > { %v2819_v2 = vadd.f32 %v1239_v54, %v1211_v52 }
 0x178   : > { %v1297_v57 = vpop.f32.mrf.mxu3  ;;  %v1242_v29 = vpop.f32.mrf.mxu1 }
 0x17a   : > { %v1268_v3 = vpop.f32.mrf.mxu2  ;;  %1473 = vmatmul.bf16.gmra.mxu1 %v2674_v49 }
 0x17b   : > { %v1269_v23 = vadd.f32 %v1268_v3, %v2812_v9  ;;  %v1213_v61 = vpop.f32.mrf.mxu0 }
 0x17c   : > { %v1214_v50 = vadd.f32 %v1213_v61, %v2781_v46 }
 0x17d   : > { %v2823_v0 = vadd.f32 %v1297_v57, %v1269_v23  ;;  %1531 = vmatmul.bf16.gmra.mxu3 %v2723_v5 }
 0x17e   : > { %v2825_v4 = vadd.f32 %v1242_v29, %v1214_v50  ;;  %1444 = vmatmul.bf16.gmra.mxu0 %v2672_v47 }
 0x17f   : > { %1502 = vmatmul.bf16.gmra.mxu2 %v2721_v60 }
 0x180   : > { %v1300_v55 = vpop.f32.mrf.mxu3  ;;  %v1244_v63 = vpop.f32.mrf.mxu1 }
 0x182   : > { %v1271_v42 = vpop.f32.mrf.mxu2 }
 0x183   : > { %v1272_v14 = vadd.f32 %v1271_v42, %v2812_v9  ;;  %v1215_v58 = vpop.f32.mrf.mxu0 }
 0x184   : > { %v1216_v46 = vadd.f32 %v1215_v58, %v2784_v59 }
 0x185   : > { %v2833_v51 = vadd.f32 %v1300_v55, %v1272_v14 }
 0x186   : > { %v2835_v36 = vadd.f32 %v1244_v63, %v1216_v46 }
 0x188   : > { %v1302_v49 = vpop.f32.mrf.mxu3  ;;  %v1247_v5 = vpop.f32.mrf.mxu1 }
 0x18a   : > { %v1273_v56 = vpop.f32.mrf.mxu2  ;;  %1478 = vmatmul.bf16.gmra.mxu1 %v2686_v35 }
 0x18b   : > { %v1274_v47 = vadd.f32 %v1273_v56, %v2812_v9  ;;  %v1218_v45 = vpop.f32.mrf.mxu0 }
 0x18c   : > { %v1219_v60 = vadd.f32 %v1218_v45, %v2791_v6 }
 0x18d   : > { %v2839_v7 = vadd.f32 %v1302_v49, %v1274_v47  ;;  %1536 = vmatmul.bf16.gmra.mxu3 %v2737_v43 }
 0x18e   : > { %v2841_v10 = vadd.f32 %v1247_v5, %v1219_v60  ;;  %1449 = vmatmul.bf16.gmra.mxu0 %v2684_v34 }
 0x18f   : > { %1507 = vmatmul.bf16.gmra.mxu2 %v2735_v24 }
 0x190   : > { %v1305_v39 = vpop.f32.mrf.mxu3  ;;  %v1249_v33 = vpop.f32.mrf.mxu1 }
 0x192   : > { %v1276_v59 = vpop.f32.mrf.mxu2 }
 0x193   : > { %v1277_v38 = vadd.f32 %v1276_v59, %v2812_v9  ;;  %v1220_v48 = vpop.f32.mrf.mxu0 }
 0x194   : > { %v1221_v6 = vadd.f32 %v1220_v48, %v2794_v32 }
 0x195   : > { %v2849_v31 = vadd.f32 %v1305_v39, %v1277_v38 }
 0x196   : > { %v2851_v11 = vadd.f32 %v1249_v33, %v1221_v6 }
 0x198   : > { %v1307_v35 = vpop.f32.mrf.mxu3  ;;  %v1252_v43 = vpop.f32.mrf.mxu1 }
 0x19a   : > { %v1278_v16 = vpop.f32.mrf.mxu2  ;;  %1483 = vmatmul.bf16.gmra.mxu1 %v2698_v28 }
 0x19b   : > { %v1279_v34 = vadd.f32 %v1278_v16, %v2812_v9  ;;  %v1223_v12 = vpop.f32.mrf.mxu0 }
 0x19c   : > { %v1224_v24 = vadd.f32 %v1223_v12, %v2801_v17 }
 0x19d   : > { %v2855_v8 = vadd.f32 %v1307_v35, %v1279_v34  ;;  %1541 = vmatmul.bf16.gmra.mxu3 %v2751_v20 }
 0x19e   : > { %v2857_v15 = vadd.f32 %v1252_v43, %v1224_v24  ;;  %1454 = vmatmul.bf16.gmra.mxu0 %v2696_v27 }
 0x19f   : > { %1512 = vmatmul.bf16.gmra.mxu2 %v2749_v13 }
 0x1a0   : > { %v1310_v53 = vpop.f32.mrf.mxu3  ;;  %v1254_v40 = vpop.f32.mrf.mxu1 }
 0x1a2   : > { %v1281_v32 = vpop.f32.mrf.mxu2 }
 0x1a3   : > { %v1282_v21 = vadd.f32 %v1281_v32, %v2812_v9  ;;  %v1225_v22 = vpop.f32.mrf.mxu0 }
 0x1a4   : > { %v1226_v17 = vadd.f32 %v1225_v22, %v2804_v25 }
 0x1a5   : > { %v2865_v18 = vadd.f32 %v1310_v53, %v1282_v21 }
 0x1a6   : > { %v2867_v19 = vadd.f32 %v1254_v40, %v1226_v17 }
 0x1a8   : > { %v1312_v28 = vpop.f32.mrf.mxu3  ;;  %v1353_v13 = vpop.f32.mrf.mxu1 }
 0x1aa   : > { %v1283_v44 = vpop.f32.mrf.mxu2 }
 0x1ab   : > { %v1284_v27 = vadd.f32 %v1283_v44, %v2812_v9  ;;  %v1324_v62 = vpop.f32.mrf.mxu0 }
 0x1ac   : > { %v1325_v5 = vadd.f32 %v1324_v62, %v2817_v41 }
 0x1ad   : > { %v2870_v37 = vadd.f32 %v1312_v28, %v1284_v27 }
 0x1ae   : > { %v1354_v6 = vadd.f32 %v1353_v13, %v1325_v5 }
 0x1b0   : > { %v1411_v1 = vpop.f32.mrf.mxu3  ;;  %v1355_v52 = vpop.f32.mrf.mxu1 }
 0x1b2   : > { %v1382_v20 = vpop.f32.mrf.mxu2 }
 0x1b3   : > { %v1326_v30 = vpop.f32.mrf.mxu0  ;;  %v1383_v33 = vadd.f32 %v1382_v20, %v1354_v6 }
 0x1b4   : > { %v1327_v16 = vadd.f32 %v1326_v30, %v2823_v0 }
 0x1b5   : > { %v1412_v35 = vadd.f32 %v1411_v1, %v1383_v33 }
 0x1b6   : > { %v1356_v41 = vadd.f32 %v1355_v52, %v1327_v16 }
 0x1b8   : > { %v1413_v3 = vpop.f32.mrf.mxu3  ;;  %v1358_v23 = vpop.f32.mrf.mxu1 }
 0x1ba   : > { %v1384_v54 = vpop.f32.mrf.mxu2 }
 0x1bb   : > { %v1329_v25 = vpop.f32.mrf.mxu0  ;;  %v1385_v21 = vadd.f32 %v1384_v54, %v1356_v41 }
 0x1bc   : > { %v1330_v53 = vadd.f32 %v1329_v25, %v2833_v51 }
 0x1bd   : > { %v1414_v40 = vadd.f32 %v1413_v3, %v1385_v21 }
 0x1be   : > { %v1359_v0 = vadd.f32 %v1358_v23, %v1330_v53 }
 0x1c0   : > { %v1416_v61 = vpop.f32.mrf.mxu3  ;;  %v1360_v29 = vpop.f32.mrf.mxu1 }
 0x1c2   : > { %v1387_v57 = vpop.f32.mrf.mxu2 }
 0x1c3   : > { %v1331_v50 = vpop.f32.mrf.mxu0  ;;  %v1388_v1 = vadd.f32 %v1387_v57, %v1359_v0 }
 0x1c4   : > { %v1332_v5 = vadd.f32 %v1331_v50, %v2839_v7 }
 0x1c5   : > { %v1417_v6 = vadd.f32 %v1416_v61, %v1388_v1 }
 0x1c6   : > { %v1361_v16 = vadd.f32 %v1360_v29, %v1332_v5 }
 0x1c8   : > { %v1418_v14 = vpop.f32.mrf.mxu3  ;;  %v1363_v55 = vpop.f32.mrf.mxu1 }
 0x1ca   : > { %v1389_v42 = vpop.f32.mrf.mxu2 }
 0x1cb   : > { %v1334_v9 = vpop.f32.mrf.mxu0 }
 0x1cc   : > { %v1335_v57 = vadd.f32 %v1334_v9, %v2849_v31 }
 0x1ce   : > { %v1364_v53 = vadd.f32 %v1363_v55, %v1335_v57 }
 0x1d0   : > { %v2874_v46 = vpop.f32.mrf.mxu3  ;;  %v2878_v56 = vpop.f32.mrf.mxu1 }
 0x1d2   : > { %v2872_v58 = vpop.f32.mrf.mxu2 }
 0x1d3   : > { %v2876_v63 = vpop.f32.mrf.mxu0  ;;  %v1393_v29 = vadd.f32 %v2872_v58, %v1364_v53 }
 0x1d5   : > { %v1422_v9 = vadd.f32 %v2874_v46, %v1393_v29 }
 0x1d8   : > { %v2882_v49 = vpop.f32.mrf.mxu3  ;;  %v2886_v60 = vpop.f32.mrf.mxu1 }
 0x1da   : > { %v2880_v47 = vpop.f32.mrf.mxu2 }
 0x1db   : > { %v2884_v45 = vpop.f32.mrf.mxu0 }
 0x1e0   : > { %v2891_v38 = vpop.f32.mrf.mxu3  ;;  %v2895_v48 = vpop.f32.mrf.mxu1 }
 0x1e2   : > { %v2889_v59 = vpop.f32.mrf.mxu2 }
 0x1e3   : > { %v2893_v39 = vpop.f32.mrf.mxu0 }
 0x1e8   : > { %v2900_v12 = vpop.f32.mrf.mxu3  ;;  %v1469_v43 = vpop.f32.mrf.mxu1 }
 0x1ea   : > { %v2898_v34 = vpop.f32.mrf.mxu2 }
 0x1eb   : > { %v1440_v24 = vpop.f32.mrf.mxu0 }
 0x1ec   : > { %v1441_v32 = vadd.f32 %v1440_v24, %v1412_v35 }
 0x1ee   : > { %v1470_v22 = vadd.f32 %v1469_v43, %v1441_v32  ;;  %v1390_v43 = vadd.f32 %v1389_v42, %v1361_v16 }
 0x1f0   : > { %v1527_v27 = vpop.f32.mrf.mxu3  ;;  %v1471_v62 = vpop.f32.mrf.mxu1  ;;  %v1419_v7 = vadd.f32 %v1418_v14, %v1390_v43 }
 0x1f2   : > { %v1498_v17 = vpop.f32.mrf.mxu2 }
 0x1f3   : > { %v1499_v44 = vadd.f32 %v1498_v17, %v1470_v22  ;;  %v1442_v28 = vpop.f32.mrf.mxu0 }
 0x1f4   : > { %v1443_v20 = vadd.f32 %v1442_v28, %v1414_v40 }
 0x1f5   : > { %v1528_v13 = vadd.f32 %v1527_v27, %v1499_v44 }
 0x1f6   : > { %v1472_v52 = vadd.f32 %v1471_v62, %v1443_v20 }
 0x1f7   : > { %v1547_v30 = vpack.c.bf16 %v1528_v13, %v2806_v26 }
 0x1f8   : > { %v1529_v25 = vpop.f32.mrf.mxu3  ;;  %v1474_v3 = vpop.f32.mrf.mxu1 }
 0x1f9   : > { %1555 = vst [vmem:[#allocation2] sm:$0xff] %v1547_v30 }
 0x1fa   : > { %v1500_v54 = vpop.f32.mrf.mxu2 }
 0x1fb   : > { %v1501_v51 = vadd.f32 %v1500_v54, %v1472_v52  ;;  %v1445_v33 = vpop.f32.mrf.mxu0 }
 0x1fc   : > { %v1446_v24 = vadd.f32 %v1445_v33, %v1417_v6 }
 0x1fd   : > { %v1530_v35 = vadd.f32 %v1529_v25, %v1501_v51 }
 0x1fe   : > { %v1475_v26 = vadd.f32 %v1474_v3, %v1446_v24 }
 0x1ff   : > { %v1548_v23 = vpack.c.bf16 %v1530_v35, %v2819_v2  ;;  %v1337_v2 = vadd.f32 %v2876_v63, %v2855_v8  ;;  %v1340_v8 = vadd.f32 %v2884_v45, %v2865_v18  ;;  %v1342_v18 = vadd.f32 %v2893_v39, %v2870_v37 }
 0x200   : > { %v1532_v32 = vpop.f32.mrf.mxu3  ;;  %v1476_v61 = vpop.f32.mrf.mxu1 }
 0x201   : > { %1556 = vst [vmem:[#allocation2 + $0x8] sm:$0xff] %v1548_v23  ;;  %v1366_v55 = vadd.f32 %v2878_v56, %v1337_v2  ;;  %v1369_v56 = vadd.f32 %v2886_v60, %v1340_v8  ;;  %v1371_v3 = vadd.f32 %v2895_v48, %v1342_v18 }
 0x202   : > { %v1503_v41 = vpop.f32.mrf.mxu2 }
 0x203   : > { %v1504_v50 = vadd.f32 %v1503_v41, %v1475_v26  ;;  %v1447_v21 = vpop.f32.mrf.mxu0  ;;  %v1395_v58 = vadd.f32 %v2880_v47, %v1366_v55  ;;  %v1398_v47 = vadd.f32 %v2889_v59, %v1369_v56  ;;  %v1400_v59 = vadd.f32 %v2898_v34, %v1371_v3 }
 0x204   : > { %v1448_v17 = vadd.f32 %v1447_v21, %v1419_v7 }
 0x205   : > { %v1533_v22 = vadd.f32 %v1532_v32, %v1504_v50  ;;  %v1424_v46 = vadd.f32 %v2882_v49, %v1395_v58  ;;  %v1427_v49 = vadd.f32 %v2891_v38, %v1398_v47  ;;  %v1429_v39 = vadd.f32 %v2900_v12, %v1400_v59 }
 0x206   : > { %v1477_v31 = vadd.f32 %v1476_v61, %v1448_v17 }
 0x207   : > { %v1549_v40 = vpack.c.bf16 %v1533_v22, %v2825_v4 }
 0x208   : > { %v1534_v44 = vpop.f32.mrf.mxu3  ;;  %v1479_v28 = vpop.f32.mrf.mxu1 }
 0x209   : > { %1557 = vst [vmem:[#allocation2 + $0x10] sm:$0xff] %v1549_v40 }
 0x20a   : > { %v1505_v42 = vpop.f32.mrf.mxu2 }
 0x20b   : > { %v1506_v14 = vadd.f32 %v1505_v42, %v1477_v31  ;;  %v1450_v27 = vpop.f32.mrf.mxu0 }
 0x20c   : > { %v1451_v0 = vadd.f32 %v1450_v27, %v1422_v9 }
 0x20d   : > { %v1535_v62 = vadd.f32 %v1534_v44, %v1506_v14 }
 0x20e   : > { %v1480_v63 = vadd.f32 %v1479_v28, %v1451_v0 }
 0x20f   : > { %v1550_v4 = vpack.c.bf16 %v1535_v62, %v2835_v36 }
 0x210   : > { %v1537_v1 = vpop.f32.mrf.mxu3  ;;  %v1481_v5 = vpop.f32.mrf.mxu1 }
 0x211   : > { %1558 = vst [vmem:[#allocation2 + $0x18] sm:$0xff] %v1550_v4 }
 0x212   : > { %v1508_v13 = vpop.f32.mrf.mxu2 }
 0x213   : > { %v1509_v20 = vadd.f32 %v1508_v13, %v1480_v63  ;;  %v1452_v30 = vpop.f32.mrf.mxu0 }
 0x214   : > { %v1453_v54 = vadd.f32 %v1452_v30, %v1424_v46 }
 0x215   : > { %v1538_v52 = vadd.f32 %v1537_v1, %v1509_v20 }
 0x216   : > { %v1482_v45 = vadd.f32 %v1481_v5, %v1453_v54 }
 0x217   : > { %v1551_v36 = vpack.c.bf16 %v1538_v52, %v2841_v10 }
 0x218   : > { %v1539_v25 = vpop.f32.mrf.mxu3  ;;  %v1484_v35 = vpop.f32.mrf.mxu1 }
 0x219   : > { %1559 = vst [vmem:[#allocation2 + $0x20] sm:$0xff] %v1551_v36 }
 0x21a   : > { %v1510_v6 = vpop.f32.mrf.mxu2 }
 0x21b   : > { %v1511_v51 = vadd.f32 %v1510_v6, %v1482_v45  ;;  %v1455_v33 = vpop.f32.mrf.mxu0 }
 0x21c   : > { %v1456_v16 = vadd.f32 %v1455_v33, %v1427_v49 }
 0x21d   : > { %v1540_v60 = vadd.f32 %v1539_v25, %v1511_v51 }
 0x21e   : > { %v1485_v24 = vadd.f32 %v1484_v35, %v1456_v16 }
 0x21f   : > { %v1552_v10 = vpack.c.bf16 %v1540_v60, %v2851_v11 }
 0x220   : > { %v1542_v23 = vpop.f32.mrf.mxu3  ;;  %v1486_v48 = vpop.f32.mrf.mxu1 }
 0x221   : > { %1560 = vst [vmem:[#allocation2 + $0x28] sm:$0xff] %v1552_v10 }
 0x222   : > { %v1513_v37 = vpop.f32.mrf.mxu2 }
 0x223   : > { %v1514_v43 = vadd.f32 %v1513_v37, %v1485_v24  ;;  %v1457_v38 = vpop.f32.mrf.mxu0 }
 0x224   : > { %v1458_v26 = vadd.f32 %v1457_v38, %v1429_v39 }
 0x225   : > { %v1543_v57 = vadd.f32 %v1542_v23, %v1514_v43 }
 0x226   : > { %v1487_v7 = vadd.f32 %v1486_v48, %v1458_v26 }
 0x227   : > { %v1553_v41 = vpack.c.bf16 %v1543_v57, %v2857_v15 }
 0x228   : > { %v1544_v34 = vpop.f32.mrf.mxu3 }
 0x229   : > { %1561 = vst [vmem:[#allocation2 + $0x30] sm:$0xff] %v1553_v41 }
 0x22a   : > { %v1515_v50 = vpop.f32.mrf.mxu2 }
 0x22b   : > { %v1516_v32 = vadd.f32 %v1515_v50, %v1487_v7 }
 0x22d   : > { %v1545_v21 = vadd.f32 %v1544_v34, %v1516_v32 }
 0x22f   : > { %v1554_v11 = vpack.c.bf16 %v1545_v21, %v2867_v19 }
 0x231   : > { %1562 = vst [vmem:[#allocation2 + $0x38] sm:$0xff] %v1554_v11 }
 0x232 PF: > { %v1599_v15 = vld [vmem:[%s2595_s6 + $0xe0] sm:$0xff]  ;;  %v1601_v12 = vld [vmem:[%s2595_s6 + $0xf0] sm:$0xff]  ;;  %v1600_v19 = vld [vmem:[%s2595_s6 + $0xe8] sm:$0xff]  ;;  %s2067_s24 = sshll.u32 %s2405_s21, 4  ;;  %s1861_s8 = sshll.u32 %s2605_s16, 4  ;;  %s1862_s8 = int_to_ptr.vmem [resolvable:$true] %s1861_s8 }
 0x233   : > { %v1631_v61 = vld [vmem:[%s2595_s6 + $0x1e0] sm:$0xff]  ;;  %v1649_v53 = vpack.c.bf16 %v1601_v12, %v1599_v15  ;;  %v1633_v22 = vld [vmem:[%s2595_s6 + $0x1f0] sm:$0xff]  ;;  %v1602_v17 = vld [vmem:[%s2595_s6 + $0xf8] sm:$0xff]  ;;  %s1860_s14 = scalar_lea.hbm %s3074_s5, %s2067_s24  ;;  %s1846_s21 = scalar_lea.sflag [#allocation5], %s2592_s3 }
 0x234   : > { %v1665_v29 = vpack.c.bf16 %v1633_v22, %v1631_v61  ;;  %v1650_v40 = vpack.c.bf16 %v1602_v17, %v1600_v19  ;;  %v1632_v2 = vld [vmem:[%s2595_s6 + $0x1e8] sm:$0xff]  ;;  %v1634_v31 = vld [vmem:[%s2595_s6 + $0x1f8] sm:$0xff]  ;;  %v1595_v42 = vld [vmem:[%s2595_s6 + $0xc0] sm:$0xff]  ;;  %s1863_s12 = sshll.u32 %s1860_s14, 4  ;;  %s2343_s29 = scalar_lea.hbm %s3074_s5, 640  ;;  %s1864_s12 = int_to_ptr.hbm [resolvable:$true] %s1863_s12 }
 0x235   : > { %1713 = vmatpush.bf16.msra.mxu0 %v1649_v53  ;;  %v1666_v9 = vpack.c.bf16 %v1634_v31, %v1632_v2  ;;  %v1597_v14 = vld [vmem:[%s2595_s6 + $0xd0] sm:$0xff]  ;;  %v1627_v44 = vld [vmem:[%s2595_s6 + $0x1c0] sm:$0xff]  ;;  %v1596_v62 = vld [vmem:[%s2595_s6 + $0xc8] sm:$0xff]  ;;  %s2337_s17 = sshra.s32 %s1864_s12, 4  ;;  %s2338_s17 = int_to_ptr.hbm [resolvable:$true] %s2337_s17 }
 0x236   : > { %v1629_v27 = vld [vmem:[%s2595_s6 + $0x1d0] sm:$0xff]  ;;  %1742 = vmatpush.bf16.msra.mxu1 %v1665_v29  ;;  %1771 = vmatpush.bf16.msra.mxu2 %v1650_v40  ;;  %v1647_v28 = vpack.c.bf16 %v1597_v14, %v1595_v42  ;;  %v1598_v0 = vld [vmem:[%s2595_s6 + $0xd8] sm:$0xff]  ;;  %v1628_v58 = vld [vmem:[%s2595_s6 + $0x1c8] sm:$0xff]  ;;  %s2339_s13 = scalar_lea.hbm %s2338_s17, 128  ;;  %p2344_p10 = scmp.lt.s32.totalorder %s2338_s17, %s3074_s5 }
 0x237   : > { %v1663_v55 = vpack.c.bf16 %v1629_v27, %v1627_v44  ;;  %1800 = vmatpush.bf16.msra.mxu3 %v1666_v9  ;;  %v1648_v4 = vpack.c.bf16 %v1598_v0, %v1596_v62  ;;  %v1630_v8 = vld [vmem:[%s2595_s6 + $0x1d8] sm:$0xff]  ;;  %v1591_v63 = vld [vmem:[%s2595_s6 + $0xa0] sm:$0xff]  ;;  %v1593_v13 = vld [vmem:[%s2595_s6 + $0xb0] sm:$0xff]  ;;  %p2340_p4 = scmp.ne.s32.totalorder %s2338_s17, %s2339_s13  ;;  %p2345_p11 = scmp.lt.s32.totalorder %s2343_s29, %s2339_s13 }
 0x238   : > { %v1664_v46 = vpack.c.bf16 %v1630_v8, %v1628_v58  ;;  %v1623_v20 = vld [vmem:[%s2595_s6 + $0x1a0] sm:$0xff]  ;;  %v1625_v1 = vld [vmem:[%s2595_s6 + $0x1b0] sm:$0xff]  ;;  %v1592_v30 = vld [vmem:[%s2595_s6 + $0xa8] sm:$0xff]  ;;  %v1645_v5 = vpack.c.bf16 %v1593_v13, %v1591_v63 }
 0x239   : > { %1714 = vmatpush.bf16.msra.mxu0 %v1647_v28  ;;  %v1594_v56 = vld [vmem:[%s2595_s6 + $0xb8] sm:$0xff]  ;;  %v1624_v52 = vld [vmem:[%s2595_s6 + $0x1a8] sm:$0xff]  ;;  %v1661_v47 = vpack.c.bf16 %v1625_v1, %v1623_v20  ;;  %v1587_v18 = vld [vmem:[%s2595_s6 + $0x80] sm:$0xff]  ;;  %p2341_p8 = pnand %p2340_p4, %p2538_p3  ;;  %p2346_p12 = por %p2345_p11, %p2344_p10 }
 0x23a   : > { %v1626_v54 = vld [vmem:[%s2595_s6 + $0x1b8] sm:$0xff]  ;;  %1743 = vmatpush.bf16.msra.mxu1 %v1663_v55  ;;  %1772 = vmatpush.bf16.msra.mxu2 %v1648_v4  ;;  %v1646_v36 = vpack.c.bf16 %v1594_v56, %v1592_v30  ;;  %v1589_v45 = vld [vmem:[%s2595_s6 + $0x90] sm:$0xff]  ;;  %v1619_v6 = vld [vmem:[%s2595_s6 + $0x180] sm:$0xff] }
 0x23b   : > { %1801 = vmatpush.bf16.msra.mxu3 %v1664_v46  ;;  %v1662_v49 = vpack.c.bf16 %v1626_v54, %v1624_v52  ;;  %v1621_v51 = vld [vmem:[%s2595_s6 + $0x190] sm:$0xff]  ;;  %v1588_v25 = vld [vmem:[%s2595_s6 + $0x88] sm:$0xff]  ;;  %v1590_v33 = vld [vmem:[%s2595_s6 + $0x98] sm:$0xff]  ;;  %v1643_v16 = vpack.c.bf16 %v1589_v45, %v1587_v18  ;;  %p2342_p9 = pneg %p2341_p8 }
 0x23c   : > { %v1620_v3 = vld [vmem:[%s2595_s6 + $0x188] sm:$0xff]  ;;  %v1622_v60 = vld [vmem:[%s2595_s6 + $0x198] sm:$0xff]  ;;  %v1659_v35 = vpack.c.bf16 %v1621_v51, %v1619_v6  ;;  %v1644_v59 = vpack.c.bf16 %v1590_v33, %v1588_v25  ;;  %v1583_v10 = vld [vmem:[%s2595_s6 + $0x60] sm:$0xff] }
 0x23d   : > { %1715 = vmatpush.bf16.msra.mxu0 %v1645_v5  ;;  %v1585_v24 = vld [vmem:[%s2595_s6 + $0x70] sm:$0xff]  ;;  %v1615_v37 = vld [vmem:[%s2595_s6 + $0x160] sm:$0xff]  ;;  %v1660_v39 = vpack.c.bf16 %v1622_v60, %v1620_v3  ;;  %v1584_v23 = vld [vmem:[%s2595_s6 + $0x68] sm:$0xff]  ;;  %p2347_p13 = pnand %p2346_p12, %p2342_p9 }
 0x23e   : > { %1744 = vmatpush.bf16.msra.mxu1 %v1661_v47  ;;  %1773 = vmatpush.bf16.msra.mxu2 %v1646_v36  ;;  %v1617_v43 = vld [vmem:[%s2595_s6 + $0x170] sm:$0xff]  ;;  %v1586_v38 = vld [vmem:[%s2595_s6 + $0x78] sm:$0xff]  ;;  %v1616_v57 = vld [vmem:[%s2595_s6 + $0x168] sm:$0xff]  ;;  %v1641_v41 = vpack.c.bf16 %v1585_v24, %v1583_v10 }
 0x23f   : > { %1802 = vmatpush.bf16.msra.mxu3 %v1662_v49  ;;  %v1618_v26 = vld [vmem:[%s2595_s6 + $0x178] sm:$0xff]  ;;  %v1657_v48 = vpack.c.bf16 %v1617_v43, %v1615_v37  ;;  %v1642_v7 = vpack.c.bf16 %v1586_v38, %v1584_v23  ;;  %v1579_v50 = vld [vmem:[%s2595_s6 + $0x40] sm:$0xff]  ;;  %v1581_v32 = vld [vmem:[%s2595_s6 + $0x50] sm:$0xff] }
 0x240   : > { %v1611_v34 = vld [vmem:[%s2595_s6 + $0x140] sm:$0xff]  ;;  %v1658_v21 = vpack.c.bf16 %v1618_v26, %v1616_v57  ;;  %v1613_v11 = vld [vmem:[%s2595_s6 + $0x150] sm:$0xff]  ;;  %v1580_v15 = vld [vmem:[%s2595_s6 + $0x48] sm:$0xff]  ;;  %v1639_v22 = vpack.c.bf16 %v1581_v32, %v1579_v50 }
 0x241   : > { %1716 = vmatpush.bf16.msra.mxu0 %v1643_v16  ;;  %v1582_v12 = vld [vmem:[%s2595_s6 + $0x58] sm:$0xff]  ;;  %v1612_v61 = vld [vmem:[%s2595_s6 + $0x148] sm:$0xff]  ;;  %v1655_v19 = vpack.c.bf16 %v1613_v11, %v1611_v34  ;;  %v1575_v29 = vld [vmem:[%s2595_s6 + $0x20] sm:$0xff] }
 0x242   : > { %1745 = vmatpush.bf16.msra.mxu1 %v1659_v35  ;;  %1774 = vmatpush.bf16.msra.mxu2 %v1644_v59  ;;  %v1614_v53 = vld [vmem:[%s2595_s6 + $0x158] sm:$0xff]  ;;  %v1640_v17 = vpack.c.bf16 %v1582_v12, %v1580_v15  ;;  %v1577_v40 = vld [vmem:[%s2595_s6 + $0x30] sm:$0xff]  ;;  %v1607_v2 = vld [vmem:[%s2595_s6 + $0x120] sm:$0xff] }
 0x243   : > { %1803 = vmatpush.bf16.msra.mxu3 %v1660_v39  ;;  %v1656_v31 = vpack.c.bf16 %v1614_v53, %v1612_v61  ;;  %v1609_v42 = vld [vmem:[%s2595_s6 + $0x130] sm:$0xff]  ;;  %v1576_v9 = vld [vmem:[%s2595_s6 + $0x28] sm:$0xff]  ;;  %v1578_v14 = vld [vmem:[%s2595_s6 + $0x38] sm:$0xff]  ;;  %v1637_v28 = vpack.c.bf16 %v1577_v40, %v1575_v29 }
 0x244   : > { %v1608_v44 = vld [vmem:[%s2595_s6 + $0x128] sm:$0xff]  ;;  %v1610_v27 = vld [vmem:[%s2595_s6 + $0x138] sm:$0xff]  ;;  %v1653_v55 = vpack.c.bf16 %v1609_v42, %v1607_v2  ;;  %v1638_v62 = vpack.c.bf16 %v1578_v14, %v1576_v9  ;;  %v1571_v0 = vld [vmem:[%s2595_s6] sm:$0xff] }
 0x245   : > { %1717 = vmatpush.bf16.msra.mxu0 %v1641_v41  ;;  %v1573_v58 = vld [vmem:[%s2595_s6 + $0x10] sm:$0xff]  ;;  %v1603_v4 = vld [vmem:[%s2595_s6 + $0x100] sm:$0xff]  ;;  %v1654_v8 = vpack.c.bf16 %v1610_v27, %v1608_v44  ;;  %v1572_v13 = vld [vmem:[%s2595_s6 + $0x8] sm:$0xff] }
 0x246   : > { %1746 = vmatpush.bf16.msra.mxu1 %v1657_v48  ;;  %1775 = vmatpush.bf16.msra.mxu2 %v1642_v7  ;;  %v1605_v63 = vld [vmem:[%s2595_s6 + $0x110] sm:$0xff]  ;;  %v1574_v46 = vld [vmem:[%s2595_s6 + $0x18] sm:$0xff]  ;;  %v1604_v20 = vld [vmem:[%s2595_s6 + $0x108] sm:$0xff]  ;;  %v1635_v30 = vpack.c.bf16 %v1573_v58, %v1571_v0 }
 0x247   : > { %1804 = vmatpush.bf16.msra.mxu3 %v1658_v21  ;;  %v1606_v1 = vld [vmem:[%s2595_s6 + $0x118] sm:$0xff]  ;;  %v2060_v56 = vld [vmem:[#allocation2 + $0x4] sm:$0xf0]  ;;  %v1651_v52 = vpack.c.bf16 %v1605_v63, %v1603_v4  ;;  %v1636_v54 = vpack.c.bf16 %v1574_v46, %v1572_v13  ;;  %v2059_v47 = vld [vmem:[#allocation2 + $0x4] sm:$0xf] }
 0x248   : > { %v2023_v5 = vld [vmem:[#allocation2] sm:$0xf]  ;;  %v2025_v36 = vld [vmem:[#allocation2 + $0x8] sm:$0xf0]  ;;  %v1652_v18 = vpack.c.bf16 %v1606_v1, %v1604_v20  ;;  %v2031_v49 = vld [vmem:[#allocation2 + $0x10] sm:$0xf] }
 0x249   : > { %1718 = vmatpush.bf16.msra.mxu0 %v1639_v22  ;;  %v2024_v45 = vor.u32 %v2060_v56, %v2023_v5  ;;  %v2028_v6 = vor.u32 %v2059_v47, %v2025_v36  ;;  %v2062_v51 = vld [vmem:[#allocation2 + $0x14] sm:$0xf0]  ;;  %v2061_v25 = vld [vmem:[#allocation2 + $0x14] sm:$0xf]  ;;  %v2033_v33 = vld [vmem:[#allocation2 + $0x18] sm:$0xf0] }
 0x24a   : > { %1747 = vmatpush.bf16.msra.mxu1 %v1655_v19  ;;  %1776 = vmatpush.bf16.msra.mxu2 %v1640_v17  ;;  %v2032_v3 = vor.u32 %v2062_v51, %v2031_v49  ;;  %v2036_v60 = vor.u32 %v2061_v25, %v2033_v33  ;;  %v2039_v16 = vld [vmem:[#allocation2 + $0x20] sm:$0xf]  ;;  %v2064_v35 = vld [vmem:[#allocation2 + $0x24] sm:$0xf0]  ;;  %v2063_v59 = vld [vmem:[#allocation2 + $0x24] sm:$0xf] }
 0x24b   : > { %1805 = vmatpush.bf16.msra.mxu3 %v1656_v31  ;;  %v2041_v10 = vld [vmem:[#allocation2 + $0x28] sm:$0xf0]  ;;  %v2040_v24 = vor.u32 %v2064_v35, %v2039_v16  ;;  %v2047_v39 = vld [vmem:[#allocation2 + $0x30] sm:$0xf]  ;;  %v2066_v43 = vld [vmem:[#allocation2 + $0x34] sm:$0xf0] }
 0x24c   : > { %v2044_v37 = vor.u32 %v2063_v59, %v2041_v10  ;;  %v2065_v23 = vld [vmem:[#allocation2 + $0x34] sm:$0xf]  ;;  %v2049_v38 = vld [vmem:[#allocation2 + $0x38] sm:$0xf0]  ;;  %v2048_v57 = vor.u32 %v2066_v43, %v2047_v39  ;;  %v1667_v41 = vld [vmem:[%s2603_s28] sm:$0x3] }
 0x24d   : > { %1719 = vmatpush.bf16.msra.mxu0 %v1637_v28  ;;  %v2052_v26 = vor.u32 %v2065_v23, %v2049_v38  ;;  %v2995_v48 = vperm.slane %v1667_v41, 0  ;;  %v2998_v21 = vperm.slane %v1667_v41, 1 }
 0x24e   : > { %1748 = vmatpush.bf16.msra.mxu1 %v1653_v55  ;;  %1777 = vmatpush.bf16.msra.mxu2 %v1638_v62 }
 0x24f   : > { %1806 = vmatpush.bf16.msra.mxu3 %v1654_v8 }
 0x251   : > { %1720 = vmatpush.bf16.msra.mxu0 %v1635_v30 }
 0x252   : > { %1749 = vmatpush.bf16.msra.mxu1 %v1651_v52  ;;  %1778 = vmatpush.bf16.msra.mxu2 %v1636_v54 }
 0x253   : > { %1807 = vmatpush.bf16.msra.mxu3 %v1652_v18 }
 0x254   : > { %1721 = vmatmul.bf16.vlgmr.msra.gmra.mxu0 %v2024_v45 }
 0x255   : > { %1750 = vmatmul.bf16.vlgmr.msra.gmra.mxu1 %v2028_v6  ;;  %1779 = vmatmul.bf16.vlgmr.msra.gmra.mxu2 %v2024_v45 }
 0x256   : > { %1808 = vmatmul.bf16.vlgmr.msra.gmra.mxu3 %v2028_v6 }
 0x264   : > { %1726 = vmatmul.bf16.gmra.mxu0 %v2032_v3 }
 0x265   : > { %1755 = vmatmul.bf16.gmra.mxu1 %v2036_v60  ;;  %1784 = vmatmul.bf16.gmra.mxu2 %v2032_v3 }
 0x266   : > { %1813 = vmatmul.bf16.gmra.mxu3 %v2036_v60 }
 0x274   : > { %1731 = vmatmul.bf16.gmra.mxu0 %v2040_v24 }
 0x275   : > { %1760 = vmatmul.bf16.gmra.mxu1 %v2044_v37  ;;  %1789 = vmatmul.bf16.gmra.mxu2 %v2040_v24 }
 0x276   : > { %1818 = vmatmul.bf16.gmra.mxu3 %v2044_v37 }
 0x284   : > { %1736 = vmatmul.bf16.gmra.mxu0 %v2048_v57 }
 0x285   : > { %1765 = vmatmul.bf16.gmra.mxu1 %v2052_v26  ;;  %1794 = vmatmul.bf16.gmra.mxu2 %v2048_v57 }
 0x286   : > { %1823 = vmatmul.bf16.gmra.mxu3 %v2052_v26 }
 0x2d1   : > { %v1722_v7 = vpop.f32.mrf.mxu0 }
 0x2d2   : > { %v1723_v50 = vadd.f32 %v1722_v7, %v2995_v48  ;;  %v1751_v32 = vpop.f32.mrf.mxu1 }
 0x2d4   : > { %v1752_v34 = vadd.f32 %v1751_v32, %v1723_v50 }
 0x2d6   : > { %1829 = vst [vmem:[%s2605_s16] sm:$0xff] %v1752_v34 }
 0x2d8   : > { %v1780_v11 = vpop.f32.mrf.mxu2 }
 0x2d9   : > { %v1781_v15 = vadd.f32 %v1780_v11, %v2998_v21  ;;  %v1809_v12 = vpop.f32.mrf.mxu3  ;;  %v1724_v61 = vpop.f32.mrf.mxu0 }
 0x2da   : > { %v1725_v53 = vadd.f32 %v1724_v61, %v2995_v48  ;;  %v1753_v22 = vpop.f32.mrf.mxu1 }
 0x2db   : > { %v1810_v19 = vadd.f32 %v1809_v12, %v1781_v15 }
 0x2dc   : > { %v1754_v17 = vadd.f32 %v1753_v22, %v1725_v53 }
 0x2dd   : > { %1830 = vst [vmem:[%s2605_s16 + $0x8] sm:$0xff] %v1810_v19 }
 0x2de   : > { %1831 = vst [vmem:[%s2605_s16 + $0x10] sm:$0xff] %v1754_v17 }
 0x2e0   : > { %v1782_v29 = vpop.f32.mrf.mxu2 }
 0x2e1   : > { %v1783_v40 = vadd.f32 %v1782_v29, %v2998_v21  ;;  %v1811_v2 = vpop.f32.mrf.mxu3  ;;  %v1727_v31 = vpop.f32.mrf.mxu0 }
 0x2e2   : > { %v1728_v42 = vadd.f32 %v1727_v31, %v2995_v48  ;;  %v1756_v9 = vpop.f32.mrf.mxu1 }
 0x2e3   : > { %v1812_v14 = vadd.f32 %v1811_v2, %v1783_v40 }
 0x2e4   : > { %v1757_v44 = vadd.f32 %v1756_v9, %v1728_v42 }
 0x2e5   : > { %1832 = vst [vmem:[%s2605_s16 + $0x18] sm:$0xff] %v1812_v14 }
 0x2e6   : > { %1833 = vst [vmem:[%s2605_s16 + $0x20] sm:$0xff] %v1757_v44 }
 0x2e8   : > { %v1785_v27 = vpop.f32.mrf.mxu2 }
 0x2e9   : > { %v1786_v28 = vadd.f32 %v1785_v27, %v2998_v21  ;;  %v1814_v55 = vpop.f32.mrf.mxu3  ;;  %v1729_v62 = vpop.f32.mrf.mxu0 }
 0x2ea   : > { %v1730_v0 = vadd.f32 %v1729_v62, %v2995_v48  ;;  %v1758_v58 = vpop.f32.mrf.mxu1 }
 0x2eb   : > { %v1815_v4 = vadd.f32 %v1814_v55, %v1786_v28 }
 0x2ec   : > { %v1759_v8 = vadd.f32 %v1758_v58, %v1730_v0 }
 0x2ed   : > { %1834 = vst [vmem:[%s2605_s16 + $0x28] sm:$0xff] %v1815_v4 }
 0x2ee   : > { %1835 = vst [vmem:[%s2605_s16 + $0x30] sm:$0xff] %v1759_v8 }
 0x2f0   : > { %v1787_v63 = vpop.f32.mrf.mxu2 }
 0x2f1   : > { %v1788_v13 = vadd.f32 %v1787_v63, %v2998_v21  ;;  %v1816_v46 = vpop.f32.mrf.mxu3  ;;  %v1732_v20 = vpop.f32.mrf.mxu0 }
 0x2f2   : > { %v1733_v1 = vadd.f32 %v1732_v20, %v2995_v48  ;;  %v1761_v30 = vpop.f32.mrf.mxu1 }
 0x2f3   : > { %v1817_v5 = vadd.f32 %v1816_v46, %v1788_v13 }
 0x2f4   : > { %v1762_v56 = vadd.f32 %v1761_v30, %v1733_v1 }
 0x2f5   : > { %1836 = vst [vmem:[%s2605_s16 + $0x38] sm:$0xff] %v1817_v5 }
 0x2f6   : > { %1837 = vst [vmem:[%s2605_s16 + $0x40] sm:$0xff] %v1762_v56 }
 0x2f8   : > { %v1790_v52 = vpop.f32.mrf.mxu2 }
 0x2f9   : > { %v1791_v54 = vadd.f32 %v1790_v52, %v2998_v21  ;;  %v1819_v47 = vpop.f32.mrf.mxu3  ;;  %v1734_v36 = vpop.f32.mrf.mxu0 }
 0x2fa   : > { %v1735_v18 = vadd.f32 %v1734_v36, %v2995_v48  ;;  %v1763_v45 = vpop.f32.mrf.mxu1 }
 0x2fb   : > { %v1820_v6 = vadd.f32 %v1819_v47, %v1791_v54 }
 0x2fc   : > { %v1764_v49 = vadd.f32 %v1763_v45, %v1735_v18 }
 0x2fd   : > { %1838 = vst [vmem:[%s2605_s16 + $0x48] sm:$0xff] %v1820_v6 }
 0x2fe   : > { %1839 = vst [vmem:[%s2605_s16 + $0x50] sm:$0xff] %v1764_v49 }
 0x300   : > { %v1792_v51 = vpop.f32.mrf.mxu2 }
 0x301   : > { %v1793_v25 = vadd.f32 %v1792_v51, %v2998_v21  ;;  %v1821_v33 = vpop.f32.mrf.mxu3  ;;  %v1737_v3 = vpop.f32.mrf.mxu0 }
 0x302   : > { %v1738_v60 = vadd.f32 %v1737_v3, %v2995_v48  ;;  %v1766_v16 = vpop.f32.mrf.mxu1 }
 0x303   : > { %v1822_v35 = vadd.f32 %v1821_v33, %v1793_v25 }
 0x304   : > { %v1767_v59 = vadd.f32 %v1766_v16, %v1738_v60 }
 0x305   : > { %1840 = vst [vmem:[%s2605_s16 + $0x58] sm:$0xff] %v1822_v35 }
 0x306   : > { %1841 = vst [vmem:[%s2605_s16 + $0x60] sm:$0xff] %v1767_v59 }
 0x308   : > { %v1795_v10 = vpop.f32.mrf.mxu2 }
 0x309   : > { %v1796_v24 = vadd.f32 %v1795_v10, %v2998_v21  ;;  %v1824_v37 = vpop.f32.mrf.mxu3  ;;  %v1739_v39 = vpop.f32.mrf.mxu0 }
 0x30a   : > { %v1740_v43 = vadd.f32 %v1739_v39, %v2995_v48  ;;  %v1768_v38 = vpop.f32.mrf.mxu1 }
 0x30b   : > { %v1825_v23 = vadd.f32 %v1824_v37, %v1796_v24 }
 0x30c   : > { %v1769_v57 = vadd.f32 %v1768_v38, %v1740_v43 }
 0x30d   : > { %1842 = vst [vmem:[%s2605_s16 + $0x68] sm:$0xff] %v1825_v23 }
 0x30e   : > { %1843 = vst [vmem:[%s2605_s16 + $0x70] sm:$0xff] %v1769_v57 }
 0x310   : > { %v1797_v26 = vpop.f32.mrf.mxu2 }
 0x311   : > { %v1798_v41 = vadd.f32 %v1797_v26, %v2998_v21  ;;  %v1826_v7 = vpop.f32.mrf.mxu3 }
 0x313   : > { %v1827_v48 = vadd.f32 %v1826_v7, %v1798_v41 }
 0x315   : > { %1844 = vst [vmem:[%s2605_s16 + $0x78] sm:$0xff] %v1827_v48 }
 0x316   : > { %2350 = shalt.err (!%p2347_p13)
}
 0x317   : > { %s2422_s7 = smov 256   ;;  %s2423_s0 = smov 1280  }
 0x318   : > { %s2424_s3 = smov 16  }
 0x319   : > { %2084 = dma.vmem_to_hbm [thread:$0]  (%p2538_p3), %s1862_s8, 2048, %s1864_s12, %s1846_s21, %s2422_s7, %s2423_s0, %s2424_s3  }
 0x31a PF: > { %s3101_s18 = sld [smem:[#allocation17_spill]]  ;;  %p2114_p0 = scmp.ge.s32.totalorder %s2413_s23, 2 }
 0x31c   : > { %p2104_p5 = pnand %p2114_p0, %p2500_p6 }
 0x31e   : > { %p2105_p7 = pneg %p2104_p5 }
 0x320   : > { %s1878_s6 = sand.u32 1, %s3101_s18  }
 0x321   : > { %s1879_s9 = scalar_lea.sflag [#allocation5], %s1878_s6 }
 0x322   : > { %2388 = dma.done.wait (%p2105_p7), %s1879_s9, 2048  }
 0x323   : > { %2390 = vsyncadd (%p2105_p7), %s1879_s9, 4294965248  ;;  %s23_s23 = sadd.s32 1, %s2413_s23   ;;  %s3103_s25 = sld [smem:[#allocation18_spill]] }
 0x324   : > { %p20_p2 = scmp.ge.s32.totalorder %s23_s23, 7   ;;  %s3104_s20 = sld [smem:[#allocation21_spill]] }
 0x325   : > { %s3105_s15 = sld [smem:[#allocation20_spill]]  ;;  %s3106_s18 = smov %s2397_s19 }
 0x326   : > { %s3108_s21 = smov %s2409_s22 }
 0x327   :  { %22 = sbr.rel (!%p20_p2) target bundleno = 12 (0xc), region = 114 }
 0x329   : > { %s3107_s19 = smov %s3103_s25 }
 0x32b   : > { %s3109_s22 = smov %s3105_s15 }
 0x32c   :  { %1885 = vsyncpa [#allocation4], 1 }
 0x32d   :  { %1887 = vsyncpa [#allocation4 + $0x1], 1 }
 0x32e   :  { %1888 = vsyncpa [#allocation7], 1 }
 0x32f   :  { %1889 = vsyncpa [#allocation10], 1 }
 0x330   :  { %1891 = vsyncpa [#allocation10 + $0x1], 1 }
 0x331   :  { %1892 = vsyncpa [#allocation5], 1 }
 0x332   :  { %1894 = vsyncpa [#allocation5 + $0x1], 1 }

</bundles_post_ra>
